<compile_context>
chip_gen: v6e
topology: v6e:2x2x1
jax: 0.10.0
libtpu: 0.0.40
codegen_flags: <defaults>
</compile_context>

<pallas_src>
import jax
import jax.numpy as jnp
from jax.experimental import pallas as pl
from jax.experimental.pallas import tpu as pltpu

NUM_SENTIMENT = 3
NUM_HUMOR = 3
NUM_SCALES = 4
ENC_DIM = 768
PROJ_DIM = 256
HEAD_HIDDEN = 256
FUSED_HIDDEN = 3 * HEAD_HIDDEN          # three head hidden layers fused -> 768
OUT_PAD = 128                           # lane-dense output slab width
SUBLANE = 8

# Column layout inside the [B, OUT_PAD] output slab.
SENT_LO, SENT_HI = 0, NUM_SENTIMENT
HUM_LO, HUM_HI = SENT_HI, SENT_HI + NUM_HUMOR
SCL_LO, SCL_HI = HUM_HI, HUM_HI + NUM_SCALES


def _meme_kernel(
    text_feat_ref, img_feat_ref,        # [B, 768] f32
    w_tp_ref, b_tp_ref,                 # [768, 256] bf16, [1, 256] f32
    w_ip_ref, b_ip_ref,                 # [768, 256] bf16, [1, 256] f32
    w_gt_ref, w_gi_ref,                 # [1, 256] f32 each (gate weight halves)
    b_g_ref,                            # (1, 1) f32 in SMEM
    w1_ref, b1_ref,                     # [256, 768] bf16, [1, 768] f32 (fused head L1)
    w2_ref, b2_ref,                     # [768, 128] bf16, [1, 128] f32 (block-diag head L2)
    out_ref,                            # [B, 128] f32 lane-dense slab
):
    text_feat = text_feat_ref[...]
    img_feat = img_feat_ref[...]

    # text_proj / img_proj (nn.Linear(768, 256)); bf16 MXU inputs, f32 accum.
    text_proj = jnp.dot(text_feat.astype(jnp.bfloat16), w_tp_ref[...],
                        preferred_element_type=jnp.float32) + b_tp_ref[...]
    img_proj = jnp.dot(img_feat.astype(jnp.bfloat16), w_ip_ref[...],
                       preferred_element_type=jnp.float32) + b_ip_ref[...]

    # TODO(synk): the reference computes cross_attn(img_proj, text_proj, text_proj)
    # but discards attn_output -- it influences no returned value, so it is
    # omitted from the hot path.

    # Fusion gate: Linear(512, 1) + Sigmoid, weight split into text/img halves
    # so no [B, 512] lane-concatenate and no N=1 MXU matmul (VPU multiply +
    # one XLU lane reduction instead).
    gate_logit = jnp.sum(text_proj * w_gt_ref[...] + img_proj * w_gi_ref[...],
                         axis=-1, keepdims=True) + b_g_ref[0, 0]
    gate = jax.nn.sigmoid(gate_logit)   # [B, 1] f32 (EUP)

    # Gated fusion: gate*text + (1-gate)*img == img + gate*(text - img).
    fused = img_proj + gate * (text_proj - img_proj)     # [B, 256] f32

    # TODO(synk): the reference __init__ declares the heads as Linear(512, 256)
    # but forward feeds them the 256-dim fused_features (a shape error in
    # PyTorch); the heads here take the 256-dim input so forward is well-defined.
    #
    # Three heads fused: one [256, 768] matmul for all hidden layers, then one
    # lane-padded block-diagonal [768, 128] matmul producing every logit.
    h = jnp.maximum(
        jnp.dot(fused.astype(jnp.bfloat16), w1_ref[...],
                preferred_element_type=jnp.float32) + b1_ref[...], 0.0)   # [B, 768]
    out_ref[...] = (jnp.dot(h.astype(jnp.bfloat16), w2_ref[...],
                            preferred_element_type=jnp.float32)
                    + b2_ref[...])                                        # [B, 128]


def init_params(key):
    """Deterministic synthetic parameters (shapes follow the module's __init__),
    stored as [in_dim, out_dim] so forward computes x @ W + b."""
    keys = jax.random.split(key, 16)

    def lin(kw, kb, fan_in, fan_out):
        scale = 1.0 / jnp.sqrt(fan_in)
        w = jax.random.uniform(kw, (fan_in, fan_out), jnp.float32, -scale, scale)
        b = jax.random.uniform(kb, (1, fan_out), jnp.float32, -scale, scale)
        return w, b

    p = {}
    p['w_tp'], p['b_tp'] = lin(keys[0], keys[1], ENC_DIM, PROJ_DIM)
    p['w_ip'], p['b_ip'] = lin(keys[2], keys[3], ENC_DIM, PROJ_DIM)
    p['w_g'], p['b_g'] = lin(keys[4], keys[5], 2 * PROJ_DIM, 1)
    p['w_s1'], p['b_s1'] = lin(keys[6], keys[7], PROJ_DIM, HEAD_HIDDEN)
    p['w_s2'], p['b_s2'] = lin(keys[8], keys[9], HEAD_HIDDEN, NUM_SENTIMENT)
    p['w_h1'], p['b_h1'] = lin(keys[10], keys[11], PROJ_DIM, HEAD_HIDDEN)
    p['w_h2'], p['b_h2'] = lin(keys[12], keys[13], HEAD_HIDDEN, NUM_HUMOR)
    p['w_c1'], p['b_c1'] = lin(keys[14], keys[15], PROJ_DIM, HEAD_HIDDEN)
    kc2w, kc2b = jax.random.split(jax.random.fold_in(key, 99))
    p['w_c2'], p['b_c2'] = lin(kc2w, kc2b, HEAD_HIDDEN, NUM_SCALES)
    return p


def pack_params(p):
    """One-time wrapper-side repack: bf16 weights, split gate weight, fused head
    layer 1, lane-padded block-diagonal head layer 2."""
    bf16 = jnp.bfloat16
    kp = {}
    kp['w_tp'] = p['w_tp'].astype(bf16)
    kp['b_tp'] = p['b_tp']
    kp['w_ip'] = p['w_ip'].astype(bf16)
    kp['b_ip'] = p['b_ip']

    # Fusion gate Linear(512, 1): split into text/img halves as [1, 256] rows
    # (kept f32 -- tiny, keeps the sigmoid input exact).
    kp['w_gt'] = p['w_g'][:PROJ_DIM, :].T
    kp['w_gi'] = p['w_g'][PROJ_DIM:, :].T
    kp['b_g'] = p['b_g'].reshape(1, 1)

    # Heads, first layers fused along the output dim -> [256, 768].
    kp['w1'] = jnp.concatenate([p['w_s1'], p['w_h1'], p['w_c1']], axis=1).astype(bf16)
    kp['b1'] = jnp.concatenate([p['b_s1'], p['b_h1'], p['b_c1']], axis=1)

    # Heads, second layers as a lane-padded block-diagonal [768, 128].
    w2 = jnp.zeros((FUSED_HIDDEN, OUT_PAD), jnp.float32)
    w2 = w2.at[0:HEAD_HIDDEN, SENT_LO:SENT_HI].set(p['w_s2'])
    w2 = w2.at[HEAD_HIDDEN:2 * HEAD_HIDDEN, HUM_LO:HUM_HI].set(p['w_h2'])
    w2 = w2.at[2 * HEAD_HIDDEN:3 * HEAD_HIDDEN, SCL_LO:SCL_HI].set(p['w_c2'])
    kp['w2'] = w2.astype(bf16)
    b2 = jnp.zeros((1, OUT_PAD), jnp.float32)
    b2 = b2.at[:, SENT_LO:SENT_HI].set(p['b_s2'])
    b2 = b2.at[:, HUM_LO:HUM_HI].set(p['b_h2'])
    b2 = b2.at[:, SCL_LO:SCL_HI].set(p['b_c2'])
    kp['b2'] = b2
    return kp


def meme_analyzer_forward(text_feat, img_feat, kp):
    B = text_feat.shape[0]
    # Pad batch to a sublane multiple so every vreg row is dense (no masked ld/st).
    Bp = max(SUBLANE, ((B + SUBLANE - 1) // SUBLANE) * SUBLANE)
    if Bp != B:
        pad = ((0, Bp - B), (0, 0))
        text_feat = jnp.pad(text_feat, pad)
        img_feat = jnp.pad(img_feat, pad)

    args = (
        text_feat, img_feat,
        kp['w_tp'], kp['b_tp'], kp['w_ip'], kp['b_ip'],
        kp['w_gt'], kp['w_gi'], kp['b_g'],
        kp['w1'], kp['b1'], kp['w2'], kp['b2'],
    )
    vmem = pltpu.MemorySpace.VMEM
    smem = pltpu.MemorySpace.SMEM
    in_specs = [pl.BlockSpec(memory_space=vmem) for _ in args]
    in_specs[8] = pl.BlockSpec(memory_space=smem)   # b_g scalar -> SMEM

    flops = 2 * Bp * (2 * ENC_DIM * PROJ_DIM          # text/img projections
                      + PROJ_DIM * FUSED_HIDDEN       # fused head layer 1
                      + FUSED_HIDDEN * OUT_PAD        # fused head layer 2
                      + 2 * PROJ_DIM)                 # gate dot products
    bytes_accessed = (sum(int(a.size) * a.dtype.itemsize for a in args)
                      + Bp * OUT_PAD * 4)
    cost = pl.CostEstimate(flops=flops, transcendentals=Bp,
                           bytes_accessed=bytes_accessed)

    # Single-program kernel: whole arrays live in VMEM (resident weights
    # ~1.4 MB bf16, far under VMEM on all generations), so every block shape
    # equals the full array shape.
    out = pl.pallas_call(
        _meme_kernel,
        out_shape=jax.ShapeDtypeStruct((Bp, OUT_PAD), jnp.float32),
        in_specs=in_specs,
        out_specs=pl.BlockSpec(memory_space=vmem),
        cost_estimate=cost,
    )(*args)

    return {
        'sentiment': out[:B, SENT_LO:SENT_HI],
        'humor': out[:B, HUM_LO:HUM_HI],
        'scales': out[:B, SCL_LO:SCL_HI],
    }


def reference_forward(text_feat, img_feat, p):
    """Pure-JAX f32 reference of the same forward (for correctness check)."""
    text_proj = text_feat @ p['w_tp'] + p['b_tp']
    img_proj = img_feat @ p['w_ip'] + p['b_ip']
    combined = jnp.concatenate([text_proj, img_proj], axis=-1)
    gate = jax.nn.sigmoid(combined @ p['w_g'] + p['b_g'])
    fused = gate * text_proj + (1.0 - gate) * img_proj

    def head(x, w1, b1, w2, b2):
        return jnp.maximum(x @ w1 + b1, 0.0) @ w2 + b2

    return {
        'sentiment': head(fused, p['w_s1'], p['b_s1'], p['w_s2'], p['b_s2']),
        'humor': head(fused, p['w_h1'], p['b_h1'], p['w_h2'], p['b_h2']),
        'scales': head(fused, p['w_c1'], p['b_c1'], p['w_c2'], p['b_c2']),
    }


if __name__ == "__main__":
    key = jax.random.PRNGKey(0)
    k_text, k_img, k_params = jax.random.split(key, 3)

    B = 8
    # Synthetic [CLS] features from the (not reimplemented) pretrained encoders.
    # TODO(synk): RoBERTa / ViT backbones require pretrained checkpoints and are
    # not reimplemented here; their pooled [CLS] features are the kernel inputs.
    text_feat = jax.random.normal(k_text, (B, ENC_DIM), jnp.float32)
    img_feat = jax.random.normal(k_img, (B, ENC_DIM), jnp.float32)

    params = init_params(k_params)
    kparams = pack_params(params)

    fwd = jax.jit(meme_analyzer_forward)
    out = fwd(text_feat, img_feat, kparams)
    jax.block_until_ready(out)

    assert out['sentiment'].shape == (B, NUM_SENTIMENT)
    assert out['humor'].shape == (B, NUM_HUMOR)
    assert out['scales'].shape == (B, NUM_SCALES)

    ref = reference_forward(text_feat, img_feat, params)
    for name in ('sentiment', 'humor', 'scales'):
        err = float(jnp.max(jnp.abs(out[name] - ref[name])))
        assert err < 5e-2, f"{name}: max abs error {err}"

    print("KERNEL_OK")
</pallas_src>

<mosaic_0001>
module attributes {stable_mosaic.version = 11 : i64} {
  func.func @_meme_kernel(%arg0: memref<8x768xf32, #tpu.memory_space<vmem>>, %arg1: memref<8x768xf32, #tpu.memory_space<vmem>>, %arg2: memref<768x256xbf16, #tpu.memory_space<vmem>>, %arg3: memref<1x256xf32, #tpu.memory_space<vmem>>, %arg4: memref<768x256xbf16, #tpu.memory_space<vmem>>, %arg5: memref<1x256xf32, #tpu.memory_space<vmem>>, %arg6: memref<1x256xf32, #tpu.memory_space<vmem>>, %arg7: memref<1x256xf32, #tpu.memory_space<vmem>>, %arg8: memref<1x1xf32, #tpu.memory_space<smem>>, %arg9: memref<256x768xbf16, #tpu.memory_space<vmem>>, %arg10: memref<1x768xf32, #tpu.memory_space<vmem>>, %arg11: memref<768x128xbf16, #tpu.memory_space<vmem>>, %arg12: memref<1x128xf32, #tpu.memory_space<vmem>>, %arg13: memref<8x128xf32, #tpu.memory_space<vmem>>) attributes {dimension_semantics = [], scalar_prefetch = 0 : i64, scratch_operands = 0 : i64, tpu.core_type = #tpu.core_type<tc>} {
    %c0 = arith.constant 0 : index
    %c0_0 = arith.constant 0 : index
    %0 = vector.load %arg0[%c0, %c0_0] : memref<8x768xf32, #tpu.memory_space<vmem>>, vector<8x768xf32>
    %c0_1 = arith.constant 0 : index
    %c0_2 = arith.constant 0 : index
    %1 = vector.load %arg1[%c0_1, %c0_2] : memref<8x768xf32, #tpu.memory_space<vmem>>, vector<8x768xf32>
    %2 = arith.truncf %0 : vector<8x768xf32> to vector<8x768xbf16>
    %c0_3 = arith.constant 0 : index
    %c0_4 = arith.constant 0 : index
    %3 = vector.load %arg2[%c0_3, %c0_4] : memref<768x256xbf16, #tpu.memory_space<vmem>>, vector<768x256xbf16>
    %cst = arith.constant dense<0.000000e+00> : vector<8x256xf32>
    %4 = tpu.matmul %2, %3, %cst {dimension_numbers = #tpu.dot_dimension_numbers<[1], [0], [0], [1], [0, 0, 1, 1], [], []>} : vector<8x768xbf16>, vector<768x256xbf16>, vector<8x256xf32> -> vector<8x256xf32>
    %c0_5 = arith.constant 0 : index
    %c0_6 = arith.constant 0 : index
    %5 = vector.load %arg3[%c0_5, %c0_6] : memref<1x256xf32, #tpu.memory_space<vmem>>, vector<1x256xf32>
    %6 = vector.broadcast %5 : vector<1x256xf32> to vector<8x256xf32>
    %7 = arith.addf %4, %6 : vector<8x256xf32>
    %8 = arith.truncf %1 : vector<8x768xf32> to vector<8x768xbf16>
    %c0_7 = arith.constant 0 : index
    %c0_8 = arith.constant 0 : index
    %9 = vector.load %arg4[%c0_7, %c0_8] : memref<768x256xbf16, #tpu.memory_space<vmem>>, vector<768x256xbf16>
    %cst_9 = arith.constant dense<0.000000e+00> : vector<8x256xf32>
    %10 = tpu.matmul %8, %9, %cst_9 {dimension_numbers = #tpu.dot_dimension_numbers<[1], [0], [0], [1], [0, 0, 1, 1], [], []>} : vector<8x768xbf16>, vector<768x256xbf16>, vector<8x256xf32> -> vector<8x256xf32>
    %c0_10 = arith.constant 0 : index
    %c0_11 = arith.constant 0 : index
    %11 = vector.load %arg5[%c0_10, %c0_11] : memref<1x256xf32, #tpu.memory_space<vmem>>, vector<1x256xf32>
    %12 = vector.broadcast %11 : vector<1x256xf32> to vector<8x256xf32>
    %13 = arith.addf %10, %12 : vector<8x256xf32>
    %c0_12 = arith.constant 0 : index
    %c0_13 = arith.constant 0 : index
    %14 = vector.load %arg6[%c0_12, %c0_13] : memref<1x256xf32, #tpu.memory_space<vmem>>, vector<1x256xf32>
    %15 = vector.broadcast %14 : vector<1x256xf32> to vector<8x256xf32>
    %16 = arith.mulf %7, %15 : vector<8x256xf32>
    %c0_14 = arith.constant 0 : index
    %c0_15 = arith.constant 0 : index
    %17 = vector.load %arg7[%c0_14, %c0_15] : memref<1x256xf32, #tpu.memory_space<vmem>>, vector<1x256xf32>
    %18 = vector.broadcast %17 : vector<1x256xf32> to vector<8x256xf32>
    %19 = arith.mulf %13, %18 : vector<8x256xf32>
    %20 = arith.addf %16, %19 : vector<8x256xf32>
    %cst_16 = arith.constant dense<0.000000e+00> : vector<8xf32>
    %21 = vector.multi_reduction <add>, %20, %cst_16 [1] : vector<8x256xf32> to vector<8xf32>
    %22 = vector.shape_cast %21 : vector<8xf32> to vector<8x1xf32>
    %c0_17 = arith.constant 0 : index
    %c0_18 = arith.constant 0 : index
    %23 = memref.load %arg8[%c0_17, %c0_18] : memref<1x1xf32, #tpu.memory_space<smem>>
    %24 = vector.broadcast %23 : f32 to vector<8x1xf32>
    %25 = arith.addf %22, %24 : vector<8x1xf32>
    %26 = arith.negf %25 : vector<8x1xf32>
    %27 = math.exp %26 : vector<8x1xf32>
    %cst_19 = arith.constant 1.000000e+00 : f32
    %28 = vector.broadcast %cst_19 : f32 to vector<8x1xf32>
    %29 = arith.addf %28, %27 : vector<8x1xf32>
    %30 = arith.divf %28, %29 : vector<8x1xf32>
    %31 = arith.subf %7, %13 : vector<8x256xf32>
    %32 = vector.broadcast %30 : vector<8x1xf32> to vector<8x256xf32>
    %33 = arith.mulf %32, %31 : vector<8x256xf32>
    %34 = arith.addf %13, %33 : vector<8x256xf32>
    %35 = arith.truncf %34 : vector<8x256xf32> to vector<8x256xbf16>
    %c0_20 = arith.constant 0 : index
    %c0_21 = arith.constant 0 : index
    %36 = vector.load %arg9[%c0_20, %c0_21] : memref<256x768xbf16, #tpu.memory_space<vmem>>, vector<256x768xbf16>
    %cst_22 = arith.constant dense<0.000000e+00> : vector<8x768xf32>
    %37 = tpu.matmul %35, %36, %cst_22 {dimension_numbers = #tpu.dot_dimension_numbers<[1], [0], [0], [1], [0, 0, 1, 1], [], []>} : vector<8x256xbf16>, vector<256x768xbf16>, vector<8x768xf32> -> vector<8x768xf32>
    %c0_23 = arith.constant 0 : index
    %c0_24 = arith.constant 0 : index
    %38 = vector.load %arg10[%c0_23, %c0_24] : memref<1x768xf32, #tpu.memory_space<vmem>>, vector<1x768xf32>
    %39 = vector.broadcast %38 : vector<1x768xf32> to vector<8x768xf32>
    %40 = arith.addf %37, %39 : vector<8x768xf32>
    %cst_25 = arith.constant 0.000000e+00 : f32
    %41 = vector.broadcast %cst_25 : f32 to vector<8x768xf32>
    %42 = arith.maximumf %40, %41 : vector<8x768xf32>
    %43 = arith.truncf %42 : vector<8x768xf32> to vector<8x768xbf16>
    %c0_26 = arith.constant 0 : index
    %c0_27 = arith.constant 0 : index
    %44 = vector.load %arg11[%c0_26, %c0_27] : memref<768x128xbf16, #tpu.memory_space<vmem>>, vector<768x128xbf16>
    %cst_28 = arith.constant dense<0.000000e+00> : vector<8x128xf32>
    %45 = tpu.matmul %43, %44, %cst_28 {dimension_numbers = #tpu.dot_dimension_numbers<[1], [0], [0], [1], [0, 0, 1, 1], [], []>} : vector<8x768xbf16>, vector<768x128xbf16>, vector<8x128xf32> -> vector<8x128xf32>
    %c0_29 = arith.constant 0 : index
    %c0_30 = arith.constant 0 : index
    %46 = vector.load %arg12[%c0_29, %c0_30] : memref<1x128xf32, #tpu.memory_space<vmem>>, vector<1x128xf32>
    %47 = vector.broadcast %46 : vector<1x128xf32> to vector<8x128xf32>
    %48 = arith.addf %45, %47 : vector<8x128xf32>
    %c0_31 = arith.constant 0 : index
    %c0_32 = arith.constant 0 : index
    %49 = vector.load %arg13[%c0_31, %c0_32] : memref<8x128xf32, #tpu.memory_space<vmem>>, vector<8x128xf32>
    tpu.vector_store %arg13[%c0_31, %c0_32], %48 {strides = array<i32>} : memref<8x128xf32, #tpu.memory_space<vmem>>, vector<8x128xf32>,
    return
  }
}

</mosaic_0001>

<bundles_post_ra>
// kernel: meme_analyzer_forward.1
= control target key start
LH: loop header
LB: loop body
LE: loop exit
PB: predicated region body
PF: predicated region fallthrough
CT: control target
= control target key end

     0   :  { %19 = vsyncpa [#allocation4], 0  ;;  %s4127_s0 = inlined_call_operand.hbm [shape: f32[8,768], index: 0, kind: input, shape index: {}]   ;;  %s4128_s1 = inlined_call_operand.hbm [shape: f32[8,768], index: 1, kind: input, shape index: {}]   ;;  %s4129_s2 = inlined_call_operand.hbm [shape: bf16[768,256], index: 2, kind: input, shape index: {}]   ;;  %s4130_s3 = inlined_call_operand.vmem [shape: f32[1,256], index: 3, kind: input, shape index: {}]   ;;  %s4131_s4 = inlined_call_operand.hbm [shape: bf16[768,256], index: 4, kind: input, shape index: {}]   ;;  %s4132_s5 = inlined_call_operand.vmem [shape: f32[1,256], index: 5, kind: input, shape index: {}]   ;;  %s4133_s6 = inlined_call_operand.vmem [shape: f32[1,256], index: 6, kind: input, shape index: {}]   ;;  %s4134_s7 = inlined_call_operand.vmem [shape: f32[1,256], index: 7, kind: input, shape index: {}]   ;;  %s4135_s8 = inlined_call_operand.<no memory space> [shape: f32[1,1], index: 8, kind: input, shape index: {}]   ;;  %s4136_s9 = inlined_call_operand.hbm [shape: bf16[256,768], index: 9, kind: input, shape index: {}]   ;;  %s4137_s10 = inlined_call_operand.hbm [shape: f32[1,768], index: 10, kind: input, shape index: {}]   ;;  %s4138_s11 = inlined_call_operand.hbm [shape: bf16[768,128], index: 11, kind: input, shape index: {}]   ;;  %s4139_s12 = inlined_call_operand.vmem [shape: f32[1,128], index: 12, kind: input, shape index: {}]   ;;  %s4140_s13 = inlined_call_operand.vmem [shape: f32[8,128], index: 13, kind: output, shape index: {}]  }
   0x1   :  { %20 = vsyncpa [#allocation6], 0 }
   0x2   :  { %21 = vsyncpa [#allocation9], 0 }
   0x3   :  { %22 = vsyncpa [#allocation12], 0  ;;  %s3943_s25 = smov [#allocation5]  }
   0x4   :  { %s39_s26 = sshll.u32 %s3943_s25, 4  ;;  %s40_s26 = int_to_ptr.vmem [resolvable:$true] %s39_s26 }
   0x5   :  { %s3803_s27 = scalar_lea.vmem %s40_s26, 768  ;;  %p3808_p1 = scmp.lt.s32.totalorder %s40_s26, %s40_s26 }
   0x6   :  { %p3804_p0 = scmp.ne.s32.totalorder %s40_s26, %s3803_s27  ;;  %p3809_p2 = scmp.lt.s32.totalorder %s3803_s27, %s3803_s27 }
   0x8   :  { %p3810_p3 = por %p3809_p2, %p3808_p1 }
   0xa   :  { %p3811_p4 = pnand %p3810_p3, %p3804_p0 }
   0xc   :  { %3814 = shalt.err (!%p3811_p4)
}
   0xd   :  { %42 = dma.hbm_to_vmem [thread:$0]  %s4128_s1, 768, %s40_s26, [#allocation6]  }
   0xe   :  { %s3944_s30 = smov [#allocation8]   ;;  %s3945_s15 = smov [#allocation11]  }
   0xf   :  { %s62_s14 = sshll.u32 %s3944_s30, 4  ;;  %s95_s16 = sshll.u32 %s3945_s15, 4  ;;  %s63_s14 = int_to_ptr.vmem [resolvable:$true] %s62_s14  ;;  %s96_s16 = int_to_ptr.vmem [resolvable:$true] %s95_s16 }
  0x10   :  { %s3823_s17 = scalar_lea.vmem %s63_s14, 12288  ;;  %p3828_p6 = scmp.lt.s32.totalorder %s63_s14, %s63_s14 }
  0x11   :  { %p3824_p5 = scmp.ne.s32.totalorder %s63_s14, %s3823_s17  ;;  %p3829_p7 = scmp.lt.s32.totalorder %s3823_s17, %s3823_s17 }
  0x13   :  { %p3830_p8 = por %p3829_p7, %p3828_p6 }
  0x15   :  { %p3831_p9 = pnand %p3830_p8, %p3824_p5 }
  0x17   :  { %3834 = shalt.err (!%p3831_p9)
}
  0x18   :  { %s3946_s18 = smov 128   ;;  %s3947_s19 = smov 8  }
  0x19   :  { %68 = dma.hbm_to_vmem [thread:$0]  %s4131_s4, 12288, %s63_s14, [#allocation9], %s3946_s18, %s3946_s18, %s3947_s19  }
  0x1a   :  { %s3843_s1 = scalar_lea.vmem %s96_s16, 96  ;;  %p3848_p11 = scmp.lt.s32.totalorder %s96_s16, %s96_s16 }
  0x1b   :  { %p3844_p10 = scmp.ne.s32.totalorder %s96_s16, %s3843_s1  ;;  %p3849_p12 = scmp.lt.s32.totalorder %s3843_s1, %s3843_s1 }
  0x1d   :  { %p3850_p13 = por %p3849_p12, %p3848_p11 }
  0x1f   :  { %p3851_p0 = pnand %p3850_p13, %p3844_p10 }
  0x21   :  { %3854 = shalt.err (!%p3851_p0)
}
  0x22   :  { %98 = dma.hbm_to_vmem [thread:$0]  %s4137_s10, 96, %s96_s16, [#allocation12]  }
  0x23   :  { %s3948_s24 = smov [#allocation3]   ;;  %s3949_s26 = smov [#allocation7]  }
  0x24   :  { %s29_s25 = sshll.u32 %s3948_s24, 4  ;;  %s48_s27 = sshll.u32 %s3949_s26, 4  ;;  %s30_s25 = int_to_ptr.vmem [resolvable:$true] %s29_s25  ;;  %s49_s27 = int_to_ptr.vmem [resolvable:$true] %s48_s27 }
  0x25   :  { %s3863_s28 = scalar_lea.vmem %s30_s25, 768  ;;  %p3868_p2 = scmp.lt.s32.totalorder %s30_s25, %s30_s25 }
  0x26   :  { %p3864_p1 = scmp.ne.s32.totalorder %s30_s25, %s3863_s28  ;;  %p3869_p3 = scmp.lt.s32.totalorder %s3863_s28, %s3863_s28 }
  0x28   :  { %p3870_p4 = por %p3869_p3, %p3868_p2 }
  0x2a   :  { %p3871_p5 = pnand %p3870_p4, %p3864_p1 }
  0x2c   :  { %3874 = shalt.err (!%p3871_p5)
}
  0x2d   :  { %32 = dma.hbm_to_vmem [thread:$0]  %s4127_s0, 768, %s30_s25, [#allocation4]  }
  0x2e   :  { %s3883_s30 = scalar_lea.vmem %s49_s27, 12288  ;;  %p3888_p7 = scmp.lt.s32.totalorder %s49_s27, %s49_s27 }
  0x2f   :  { %p3884_p6 = scmp.ne.s32.totalorder %s49_s27, %s3883_s30  ;;  %p3889_p8 = scmp.lt.s32.totalorder %s3883_s30, %s3883_s30 }
  0x31   :  { %p3890_p9 = por %p3889_p8, %p3888_p7 }
  0x33   :  { %p3891_p10 = pnand %p3890_p9, %p3884_p6 }
  0x35   :  { %3894 = shalt.err (!%p3891_p10)
}
  0x36   :  { %54 = dma.hbm_to_vmem [thread:$0]  %s4129_s2, 12288, %s49_s27, [#allocation6], %s3946_s18, %s3946_s18, %s3947_s19  }
  0x37   :  { %s3950_s15 = smov [#allocation10]  }
  0x38   :  { %s82_s16 = sshll.u32 %s3950_s15, 4  ;;  %s83_s16 = int_to_ptr.vmem [resolvable:$true] %s82_s16 }
  0x39   :  { %s3903_s17 = scalar_lea.vmem %s83_s16, 12288  ;;  %p3908_p12 = scmp.lt.s32.totalorder %s83_s16, %s83_s16 }
  0x3a   :  { %p3904_p11 = scmp.ne.s32.totalorder %s83_s16, %s3903_s17  ;;  %p3909_p13 = scmp.lt.s32.totalorder %s3903_s17, %s3903_s17 }
  0x3c   :  { %p3910_p0 = por %p3909_p13, %p3908_p12 }
  0x3e   :  { %p3911_p1 = pnand %p3910_p0, %p3904_p11 }
  0x40   :  { %3914 = shalt.err (!%p3911_p1)
}
  0x41   :  { %s3951_s0 = smov 384   ;;  %s3952_s20 = smov 24  }
  0x42   :  { %88 = dma.hbm_to_vmem [thread:$0]  %s4136_s9, 12288, %s83_s16, [#allocation9], %s3951_s0, %s3951_s0, %s3952_s20  }
  0x43   :  { %s3953_s22 = smov [#allocation13]  }
  0x44   :  { %s104_s23 = sshll.u32 %s3953_s22, 4  ;;  %s105_s23 = int_to_ptr.vmem [resolvable:$true] %s104_s23 }
  0x45   :  { %s3923_s2 = scalar_lea.vmem %s105_s23, 6144  ;;  %p3928_p3 = scmp.lt.s32.totalorder %s105_s23, %s105_s23 }
  0x46   :  { %p3924_p2 = scmp.ne.s32.totalorder %s105_s23, %s3923_s2  ;;  %p3929_p4 = scmp.lt.s32.totalorder %s3923_s2, %s3923_s2 }
  0x48   :  { %p3930_p5 = por %p3929_p4, %p3928_p3 }
  0x4a   :  { %p3931_p6 = pnand %p3930_p5, %p3924_p2 }
  0x4c   :  { %3934 = shalt.err (!%p3931_p6)
}
  0x4d   :  { %s3954_s18 = smov 64   ;;  %s3955_s19 = smov 4  }
  0x4e   :  { %110 = dma.hbm_to_vmem [thread:$0]  %s4138_s11, 6144, %s105_s23, [#allocation12], %s3954_s18, %s3954_s18, %s3955_s19  }
  0x4f   :  { %3935 = dma.done.wait [#allocation4], 768  }
  0x50   :  { %3936 = vsyncadd [#allocation4], 4294966528 }
  0x51   :  { %3937 = dma.done.wait [#allocation6], 13056  }
  0x52   :  { %3938 = vsyncadd [#allocation6], 4294954240 }
  0x53   :  { %3939 = dma.done.wait [#allocation9], 24576  }
  0x54   :  { %3940 = vsyncadd [#allocation9], 4294942720 }
  0x55   :  { %3941 = dma.done.wait [#allocation12], 6240  }
  0x56   :  { %3942 = vsyncadd [#allocation12], 4294961056  ;;  %v3311_v0 = vld [vmem:[#allocation7 + $0x74] ss:$8 sps:$4 sm:$0xff]   ;;  %v3315_v2 = vld [vmem:[#allocation7 + $0x70] ss:$8 sps:$4 sm:$0xff]  }
  0x57   :  { %v3313_v1 = vld [vmem:[#allocation7 + $0x174] ss:$8 sps:$4 sm:$0xff]   ;;  %741 = vmatprep.subr.bf16.mxu0 %v3311_v0  ;;  %v3316_v3 = vld [vmem:[#allocation7 + $0x170] ss:$8 sps:$4 sm:$0xff]   ;;  %v3317_v4 = vld [vmem:[#allocation7 + $0x64] ss:$8 sps:$4 sm:$0xff]  }
  0x58   :  { %782 = vmatprep.subr.bf16.mxu1 %v3313_v1  ;;  %742 = vmatpush1.bf16.msra.mxu0 %v3315_v2  ;;  %v3319_v5 = vld [vmem:[#allocation7 + $0x164] ss:$8 sps:$4 sm:$0xff]   ;;  %v3321_v6 = vld [vmem:[#allocation7 + $0x60] ss:$8 sps:$4 sm:$0xff]   ;;  %v3323_v8 = vld [vmem:[#allocation7 + $0x54] ss:$8 sps:$4 sm:$0xff]  }
  0x59   :  { %783 = vmatpush1.bf16.msra.mxu1 %v3316_v3  ;;  %743 = vmatprep.subr.bf16.mxu0 %v3317_v4  ;;  %v3322_v7 = vld [vmem:[#allocation7 + $0x160] ss:$8 sps:$4 sm:$0xff]   ;;  %v3325_v9 = vld [vmem:[#allocation7 + $0x154] ss:$8 sps:$4 sm:$0xff]   ;;  %v3327_v10 = vld [vmem:[#allocation7 + $0x50] ss:$8 sps:$4 sm:$0xff]  }
  0x5a   :  { %784 = vmatprep.subr.bf16.mxu1 %v3319_v5  ;;  %v3328_v11 = vld [vmem:[#allocation7 + $0x150] ss:$8 sps:$4 sm:$0xff]   ;;  %v3329_v12 = vld [vmem:[#allocation7 + $0x44] ss:$8 sps:$4 sm:$0xff]   ;;  %v3333_v14 = vld [vmem:[#allocation7 + $0x40] ss:$8 sps:$4 sm:$0xff]  }
  0x5b   :  { %v3331_v13 = vld [vmem:[#allocation7 + $0x144] ss:$8 sps:$4 sm:$0xff]   ;;  %v3334_v15 = vld [vmem:[#allocation7 + $0x140] ss:$8 sps:$4 sm:$0xff]   ;;  %v3335_v16 = vld [vmem:[#allocation7 + $0x34] ss:$8 sps:$4 sm:$0xff]  }
  0x5c   :  { %744 = vmatpush1.bf16.msra.mxu0 %v3321_v6  ;;  %v3337_v17 = vld [vmem:[#allocation7 + $0x134] ss:$8 sps:$4 sm:$0xff]   ;;  %v3339_v18 = vld [vmem:[#allocation7 + $0x30] ss:$8 sps:$4 sm:$0xff]   ;;  %v3341_v20 = vld [vmem:[#allocation7 + $0x24] ss:$8 sps:$4 sm:$0xff]  }
  0x5d   :  { %785 = vmatpush1.bf16.msra.mxu1 %v3322_v7  ;;  %745 = vmatprep.subr.bf16.mxu0 %v3323_v8  ;;  %v3340_v19 = vld [vmem:[#allocation7 + $0x130] ss:$8 sps:$4 sm:$0xff]   ;;  %v3343_v21 = vld [vmem:[#allocation7 + $0x124] ss:$8 sps:$4 sm:$0xff]   ;;  %v3345_v22 = vld [vmem:[#allocation7 + $0x20] ss:$8 sps:$4 sm:$0xff]  }
  0x5e   :  { %786 = vmatprep.subr.bf16.mxu1 %v3325_v9  ;;  %v3346_v23 = vld [vmem:[#allocation7 + $0x120] ss:$8 sps:$4 sm:$0xff]   ;;  %v3347_v24 = vld [vmem:[#allocation7 + $0x14] ss:$8 sps:$4 sm:$0xff]   ;;  %v3351_v26 = vld [vmem:[#allocation7 + $0x10] ss:$8 sps:$4 sm:$0xff]  }
  0x5f   :  { %v3349_v25 = vld [vmem:[#allocation7 + $0x114] ss:$8 sps:$4 sm:$0xff]   ;;  %v3352_v27 = vld [vmem:[#allocation7 + $0x110] ss:$8 sps:$4 sm:$0xff]   ;;  %v3353_v28 = vld [vmem:[#allocation7 + $0x4] ss:$8 sps:$4 sm:$0xff]  }
  0x60   :  { %746 = vmatpush1.bf16.msra.mxu0 %v3327_v10  ;;  %v3355_v29 = vld [vmem:[#allocation7 + $0x104] ss:$8 sps:$4 sm:$0xff]   ;;  %v3357_v30 = vld [vmem:[#allocation7] ss:$8 sps:$4 sm:$0xff]   ;;  %v3359_v32 = vld [vmem:[#allocation7 + $0xf4] ss:$8 sps:$4 sm:$0xff]  }
  0x61   :  { %787 = vmatpush1.bf16.msra.mxu1 %v3328_v11  ;;  %747 = vmatprep.subr.bf16.mxu0 %v3329_v12  ;;  %v3358_v31 = vld [vmem:[#allocation7 + $0x100] ss:$8 sps:$4 sm:$0xff]   ;;  %v3361_v33 = vld [vmem:[#allocation7 + $0x1f4] ss:$8 sps:$4 sm:$0xff]   ;;  %v3363_v34 = vld [vmem:[#allocation7 + $0xf0] ss:$8 sps:$4 sm:$0xff]  }
  0x62   :  { %788 = vmatprep.subr.bf16.mxu1 %v3331_v13  ;;  %v3364_v35 = vld [vmem:[#allocation7 + $0x1f0] ss:$8 sps:$4 sm:$0xff]   ;;  %v3365_v36 = vld [vmem:[#allocation7 + $0xe4] ss:$8 sps:$4 sm:$0xff]   ;;  %v3369_v38 = vld [vmem:[#allocation7 + $0xe0] ss:$8 sps:$4 sm:$0xff]  }
  0x63   :  { %v3367_v37 = vld [vmem:[#allocation7 + $0x1e4] ss:$8 sps:$4 sm:$0xff]   ;;  %v3370_v39 = vld [vmem:[#allocation7 + $0x1e0] ss:$8 sps:$4 sm:$0xff]   ;;  %v3371_v40 = vld [vmem:[#allocation7 + $0xd4] ss:$8 sps:$4 sm:$0xff]  }
  0x64   :  { %748 = vmatpush1.bf16.msra.mxu0 %v3333_v14  ;;  %v3373_v41 = vld [vmem:[#allocation7 + $0x1d4] ss:$8 sps:$4 sm:$0xff]   ;;  %v3375_v42 = vld [vmem:[#allocation7 + $0xd0] ss:$8 sps:$4 sm:$0xff]   ;;  %v3377_v44 = vld [vmem:[#allocation7 + $0xc4] ss:$8 sps:$4 sm:$0xff]  }
  0x65   :  { %789 = vmatpush1.bf16.msra.mxu1 %v3334_v15  ;;  %749 = vmatprep.subr.bf16.mxu0 %v3335_v16  ;;  %v3376_v43 = vld [vmem:[#allocation7 + $0x1d0] ss:$8 sps:$4 sm:$0xff]   ;;  %v3379_v45 = vld [vmem:[#allocation7 + $0x1c4] ss:$8 sps:$4 sm:$0xff]   ;;  %v3381_v47 = vld [vmem:[#allocation7 + $0xc0] ss:$8 sps:$4 sm:$0xff]  }
  0x66   :  { %790 = vmatprep.subr.bf16.mxu1 %v3337_v17  ;;  %v136_v46 = vld [vmem:[#allocation3 + $0x8] sm:$0xff]  ;;  %v138_v50 = vld [vmem:[#allocation3 + $0x18] sm:$0xff]  ;;  %v135_v4 = vld [vmem:[#allocation3] sm:$0xff] }
  0x67   :  { %v3382_v48 = vld [vmem:[#allocation7 + $0x1c0] ss:$8 sps:$4 sm:$0xff]   ;;  %v148_v49 = vpack.c.bf16 %v136_v46, %v136_v46  ;;  %v3383_v51 = vld [vmem:[#allocation7 + $0xb4] ss:$8 sps:$4 sm:$0xff]   ;;  %v150_v52 = vpack.c.bf16 %v138_v50, %v138_v50  ;;  %v3387_v54 = vld [vmem:[#allocation7 + $0xb0] ss:$8 sps:$4 sm:$0xff]   ;;  %v147_v8 = vpack.c.bf16 %v135_v4, %v135_v4 }
  0x68   :  { %750 = vmatpush1.bf16.msra.mxu0 %v3339_v18  ;;  %v3385_v53 = vld [vmem:[#allocation7 + $0x1b4] ss:$8 sps:$4 sm:$0xff]   ;;  %v3388_v55 = vld [vmem:[#allocation7 + $0x1b0] ss:$8 sps:$4 sm:$0xff]   ;;  %v3389_v56 = vld [vmem:[#allocation7 + $0xa4] ss:$8 sps:$4 sm:$0xff]  }
  0x69   :  { %791 = vmatpush1.bf16.msra.mxu1 %v3340_v19  ;;  %751 = vmatprep.subr.bf16.mxu0 %v3341_v20  ;;  %v3391_v57 = vld [vmem:[#allocation7 + $0x1a4] ss:$8 sps:$4 sm:$0xff]   ;;  %v3393_v58 = vld [vmem:[#allocation7 + $0xa0] ss:$8 sps:$4 sm:$0xff]   ;;  %v3395_v60 = vld [vmem:[#allocation7 + $0x94] ss:$8 sps:$4 sm:$0xff]  }
  0x6a   :  { %792 = vmatprep.subr.bf16.mxu1 %v3343_v21  ;;  %773 = vmatprep.mubr.bf16.mxu0 %v148_v49  ;;  %v3394_v59 = vld [vmem:[#allocation7 + $0x1a0] ss:$8 sps:$4 sm:$0xff]   ;;  %v3397_v61 = vld [vmem:[#allocation7 + $0x194] ss:$8 sps:$4 sm:$0xff]   ;;  %v3399_v62 = vld [vmem:[#allocation7 + $0x90] ss:$8 sps:$4 sm:$0xff]  }
  0x6b   :  { %814 = vmatprep.mubr.bf16.mxu1 %v150_v52  ;;  %v3400_v63 = vld [vmem:[#allocation7 + $0x190] ss:$8 sps:$4 sm:$0xff]   ;;  %v3401_v0 = vld [vmem:[#allocation7 + $0x84] ss:$8 sps:$4 sm:$0xff]   ;;  %v3405_v2 = vld [vmem:[#allocation7 + $0x80] ss:$8 sps:$4 sm:$0xff]  }
  0x6c   :  { %752 = vmatpush1.bf16.msra.mxu0 %v3345_v22  ;;  %v3403_v1 = vld [vmem:[#allocation7 + $0x184] ss:$8 sps:$4 sm:$0xff]   ;;  %v3406_v3 = vld [vmem:[#allocation7 + $0x180] ss:$8 sps:$4 sm:$0xff]   ;;  %v137_v5 = vld [vmem:[#allocation3 + $0x10] sm:$0xff] }
  0x6d   :  { %793 = vmatpush1.bf16.msra.mxu1 %v3346_v23  ;;  %753 = vmatprep.subr.bf16.mxu0 %v3347_v24  ;;  %v3409_v6 = vld [vmem:[#allocation7 + $0x274] ss:$8 sps:$4 sm:$0xff]   ;;  %v149_v9 = vpack.c.bf16 %v137_v5, %v137_v5  ;;  %v3407_v10 = vld [vmem:[#allocation7 + $0x270] ss:$8 sps:$4 sm:$0xff]   ;;  %v3415_v12 = vld [vmem:[#allocation7 + $0x264] ss:$8 sps:$4 sm:$0xff]  }
  0x6e   :  { %794 = vmatprep.subr.bf16.mxu1 %v3349_v25  ;;  %v3412_v7 = vld [vmem:[#allocation8 + $0x74] ss:$8 sps:$4 sm:$0xff]   ;;  %v3410_v11 = vld [vmem:[#allocation8 + $0x70] ss:$8 sps:$4 sm:$0xff]   ;;  %v3418_v13 = vld [vmem:[#allocation8 + $0x64] ss:$8 sps:$4 sm:$0xff]  }
  0x6f   :  { %v3413_v14 = vld [vmem:[#allocation7 + $0x260] ss:$8 sps:$4 sm:$0xff]   ;;  %v3421_v16 = vld [vmem:[#allocation7 + $0x254] ss:$8 sps:$4 sm:$0xff]   ;;  %v3419_v18 = vld [vmem:[#allocation7 + $0x250] ss:$8 sps:$4 sm:$0xff]  }
  0x70   :  { %754 = vmatpush1.bf16.msra.mxu0 %v3351_v26  ;;  %v3416_v15 = vld [vmem:[#allocation8 + $0x60] ss:$8 sps:$4 sm:$0xff]   ;;  %v3424_v17 = vld [vmem:[#allocation8 + $0x54] ss:$8 sps:$4 sm:$0xff]   ;;  %v3422_v19 = vld [vmem:[#allocation8 + $0x50] ss:$8 sps:$4 sm:$0xff]  }
  0x71   :  { %795 = vmatpush1.bf16.msra.mxu1 %v3352_v27  ;;  %755 = vmatprep.subr.bf16.mxu0 %v3353_v28  ;;  %v3427_v20 = vld [vmem:[#allocation7 + $0x244] ss:$8 sps:$4 sm:$0xff]   ;;  %v3425_v22 = vld [vmem:[#allocation7 + $0x240] ss:$8 sps:$4 sm:$0xff]   ;;  %v3433_v24 = vld [vmem:[#allocation7 + $0x234] ss:$8 sps:$4 sm:$0xff]  }
  0x72   :  { %796 = vmatprep.subr.bf16.mxu1 %v3355_v29  ;;  %v3430_v21 = vld [vmem:[#allocation8 + $0x44] ss:$8 sps:$4 sm:$0xff]   ;;  %v3428_v23 = vld [vmem:[#allocation8 + $0x40] ss:$8 sps:$4 sm:$0xff]   ;;  %v3436_v25 = vld [vmem:[#allocation8 + $0x34] ss:$8 sps:$4 sm:$0xff]  }
  0x73   :  { %v3431_v26 = vld [vmem:[#allocation7 + $0x230] ss:$8 sps:$4 sm:$0xff]   ;;  %v3439_v28 = vld [vmem:[#allocation7 + $0x224] ss:$8 sps:$4 sm:$0xff]   ;;  %v3461_v50 = vld [vmem:[#allocation7 + $0x2e0] ss:$8 sps:$4 sm:$0xff]  }
  0x74   :  { %756 = vmatpush1.bf16.msra.mxu0 %v3357_v30  ;;  %v3434_v27 = vld [vmem:[#allocation8 + $0x30] ss:$8 sps:$4 sm:$0xff]   ;;  %v3442_v29 = vld [vmem:[#allocation8 + $0x24] ss:$8 sps:$4 sm:$0xff]   ;;  %v3437_v30 = vld [vmem:[#allocation7 + $0x220] ss:$8 sps:$4 sm:$0xff]  }
  0x75   :  { %797 = vmatpush1.bf16.msra.mxu1 %v3358_v31  ;;  %757 = vmatprep.subr.bf16.mxu0 %v3359_v32  ;;  %v3440_v31 = vld [vmem:[#allocation8 + $0x20] ss:$8 sps:$4 sm:$0xff]   ;;  %v3445_v32 = vld [vmem:[#allocation7 + $0x214] ss:$8 sps:$4 sm:$0xff]   ;;  %v3455_v46 = vld [vmem:[#allocation7 + $0x2f0] ss:$8 sps:$4 sm:$0xff]  }
  0x76   :  { %798 = vmatprep.subr.bf16.mxu1 %v3361_v33  ;;  %v3448_v33 = vld [vmem:[#allocation8 + $0x14] ss:$8 sps:$4 sm:$0xff]   ;;  %v3466_v49 = vld [vmem:[#allocation8 + $0xe4] ss:$8 sps:$4 sm:$0xff]  }
  0x77   :  { %v3469_v52 = vld [vmem:[#allocation7 + $0x2d4] ss:$8 sps:$4 sm:$0xff]  }
  0x78   :  { %758 = vmatpush2.bf16.msra.mxu0 %v3363_v34  ;;  %v140_v34 = vld [vmem:[#allocation3 + $0x28] sm:$0xff]  ;;  %v3493_v4 = vld [vmem:[#allocation7 + $0x294] ss:$8 sps:$4 sm:$0xff]  }
  0x79   :  { %799 = vmatpush2.bf16.msra.mxu1 %v3364_v35  ;;  %759 = vmatprep.subr.bf16.mxu0 %v3365_v36  ;;  %v3443_v35 = vld [vmem:[#allocation7 + $0x210] ss:$8 sps:$4 sm:$0xff]   ;;  %v3496_v5 = vld [vmem:[#allocation8 + $0x94] ss:$8 sps:$4 sm:$0xff]  }
  0x7a   :  { %800 = vmatprep.subr.bf16.mxu1 %v3367_v37  ;;  %v3446_v36 = vld [vmem:[#allocation8 + $0x10] ss:$8 sps:$4 sm:$0xff]   ;;  %v152_v37 = vpack.c.bf16 %v140_v34, %v140_v34  ;;  %v3521_v34 = vld [vmem:[#allocation8 + $0x140] ss:$8 sps:$4 sm:$0xff]  }
  0x7c   :  { %760 = vmatpush2.bf16.msra.mxu0 %v3369_v38  ;;  %v142_v38 = vld [vmem:[#allocation5 + $0x8] sm:$0xff] }
  0x7d   :  { %801 = vmatpush2.bf16.msra.mxu1 %v3370_v39  ;;  %761 = vmatprep.subr.bf16.mxu0 %v3371_v40  ;;  %v3451_v39 = vld [vmem:[#allocation7 + $0x204] ss:$8 sps:$4 sm:$0xff]   ;;  %v865_v40 = vpack.c.bf16 %v142_v38, %v142_v38  ;;  %v3527_v38 = vld [vmem:[#allocation8 + $0x130] ss:$8 sps:$4 sm:$0xff]  }
  0x7e   :  { %802 = vmatprep.subr.bf16.mxu1 %v3373_v41  ;;  %v3454_v41 = vld [vmem:[#allocation8 + $0x4] ss:$8 sps:$4 sm:$0xff]  }
  0x80   :  { %762 = vmatpush2.bf16.msra.mxu0 %v3375_v42  ;;  %v3449_v42 = vld [vmem:[#allocation7 + $0x200] ss:$8 sps:$4 sm:$0xff]  }
  0x81   :  { %803 = vmatpush2.bf16.msra.mxu1 %v3376_v43  ;;  %763 = vmatprep.subr.bf16.mxu0 %v3377_v44  ;;  %v3452_v43 = vld [vmem:[#allocation8] ss:$8 sps:$4 sm:$0xff]   ;;  %v3457_v44 = vld [vmem:[#allocation7 + $0x2f4] ss:$8 sps:$4 sm:$0xff]  }
  0x82   :  { %804 = vmatprep.subr.bf16.mxu1 %v3379_v45  ;;  %v3460_v45 = vld [vmem:[#allocation8 + $0xf4] ss:$8 sps:$4 sm:$0xff]  }
  0x84   :  { %764 = vmatpush2.bf16.msra.mxu0 %v3381_v47  ;;  %v3458_v47 = vld [vmem:[#allocation8 + $0xf0] ss:$8 sps:$4 sm:$0xff]  }
  0x85   :  { %805 = vmatpush2.bf16.msra.mxu1 %v3382_v48  ;;  %765 = vmatprep.subr.bf16.mxu0 %v3383_v51  ;;  %v3463_v48 = vld [vmem:[#allocation7 + $0x2e4] ss:$8 sps:$4 sm:$0xff]   ;;  %v3464_v51 = vld [vmem:[#allocation8 + $0xe0] ss:$8 sps:$4 sm:$0xff]  }
  0x86   :  { %806 = vmatprep.subr.bf16.mxu1 %v3385_v53  ;;  %v3472_v53 = vld [vmem:[#allocation8 + $0xd4] ss:$8 sps:$4 sm:$0xff]  }
  0x88   :  { %766 = vmatpush2.bf16.msra.mxu0 %v3387_v54  ;;  %v3467_v54 = vld [vmem:[#allocation7 + $0x2d0] ss:$8 sps:$4 sm:$0xff]  }
  0x89   :  { %807 = vmatpush2.bf16.msra.mxu1 %v3388_v55  ;;  %767 = vmatprep.subr.bf16.mxu0 %v3389_v56  ;;  %v3470_v55 = vld [vmem:[#allocation8 + $0xd0] ss:$8 sps:$4 sm:$0xff]   ;;  %v3475_v56 = vld [vmem:[#allocation7 + $0x2c4] ss:$8 sps:$4 sm:$0xff]  }
  0x8a   :  { %808 = vmatprep.subr.bf16.mxu1 %v3391_v57  ;;  %v3478_v57 = vld [vmem:[#allocation8 + $0xc4] ss:$8 sps:$4 sm:$0xff]  }
  0x8c   :  { %768 = vmatpush2.bf16.msra.mxu0 %v3393_v58  ;;  %v3473_v58 = vld [vmem:[#allocation7 + $0x2c0] ss:$8 sps:$4 sm:$0xff]  }
  0x8d   :  { %809 = vmatpush2.bf16.msra.mxu1 %v3394_v59  ;;  %769 = vmatprep.subr.bf16.mxu0 %v3395_v60  ;;  %v3476_v59 = vld [vmem:[#allocation8 + $0xc0] ss:$8 sps:$4 sm:$0xff]   ;;  %v3481_v60 = vld [vmem:[#allocation7 + $0x2b4] ss:$8 sps:$4 sm:$0xff]  }
  0x8e   :  { %810 = vmatprep.subr.bf16.mxu1 %v3397_v61  ;;  %v3484_v61 = vld [vmem:[#allocation8 + $0xb4] ss:$8 sps:$4 sm:$0xff]  }
  0x90   :  { %770 = vmatpush2.bf16.msra.mxu0 %v3399_v62  ;;  %v3479_v62 = vld [vmem:[#allocation7 + $0x2b0] ss:$8 sps:$4 sm:$0xff]  }
  0x91   :  { %811 = vmatpush2.bf16.msra.mxu1 %v3400_v63  ;;  %771 = vmatprep.subr.bf16.mxu0 %v3401_v0  ;;  %v3482_v63 = vld [vmem:[#allocation8 + $0xb0] ss:$8 sps:$4 sm:$0xff]   ;;  %v3487_v0 = vld [vmem:[#allocation7 + $0x2a4] ss:$8 sps:$4 sm:$0xff]  }
  0x92   :  { %812 = vmatprep.subr.bf16.mxu1 %v3403_v1  ;;  %v3490_v1 = vld [vmem:[#allocation8 + $0xa4] ss:$8 sps:$4 sm:$0xff]  }
  0x94   :  { %772 = vmatpush2.bf16.msra.mxu0 %v3405_v2  ;;  %v3485_v2 = vld [vmem:[#allocation7 + $0x2a0] ss:$8 sps:$4 sm:$0xff]  }
  0x95   :  { %813 = vmatpush2.bf16.msra.mxu1 %v3406_v3  ;;  %823 = vmatprep.subr.bf16.mxu0 %v3409_v6  ;;  %v3488_v3 = vld [vmem:[#allocation8 + $0xa0] ss:$8 sps:$4 sm:$0xff]   ;;  %v3491_v6 = vld [vmem:[#allocation7 + $0x290] ss:$8 sps:$4 sm:$0xff]  }
  0x96   :  { %1458 = vmatprep.subr.bf16.mxu1 %v3412_v7  ;;  %v3494_v7 = vld [vmem:[#allocation8 + $0x90] ss:$8 sps:$4 sm:$0xff]  }
  0x97   :  { %774 = vmatmul.mubr.bf16.vlgmr.msra.gmra.mxu0 %v147_v8  ;;  %v3499_v8 = vld [vmem:[#allocation7 + $0x284] ss:$8 sps:$4 sm:$0xff]  }
  0x98   :  { %815 = vmatmul.mubr.bf16.vlgmr.msra.gmra.mxu1 %v149_v9  ;;  %824 = vmatpush1.bf16.msra.mxu0 %v3407_v10  ;;  %v3502_v9 = vld [vmem:[#allocation8 + $0x84] ss:$8 sps:$4 sm:$0xff]   ;;  %v3497_v10 = vld [vmem:[#allocation7 + $0x280] ss:$8 sps:$4 sm:$0xff]  }
  0x99   :  { %1459 = vmatpush1.bf16.msra.mxu1 %v3410_v11  ;;  %825 = vmatprep.subr.bf16.mxu0 %v3415_v12  ;;  %v3500_v11 = vld [vmem:[#allocation8 + $0x80] ss:$8 sps:$4 sm:$0xff]  }
  0x9a   :  { %1460 = vmatprep.subr.bf16.mxu1 %v3418_v13  ;;  %855 = vmatprep.mubr.bf16.mxu0 %v152_v37  ;;  %v139_v12 = vld [vmem:[#allocation3 + $0x20] sm:$0xff]  ;;  %v141_v13 = vld [vmem:[#allocation5] sm:$0xff] }
  0x9b   :  { %1490 = vmatprep.mubr.bf16.mxu1 %v865_v40  ;;  %v3532_v37 = vld [vmem:[#allocation8 + $0x234] ss:$8 sps:$4 sm:$0xff]   ;;  %v3535_v40 = vld [vmem:[#allocation8 + $0x124] ss:$8 sps:$4 sm:$0xff]  }
  0x9c   :  { %826 = vmatpush1.bf16.msra.mxu0 %v3413_v14  ;;  %v3505_v14 = vld [vmem:[#allocation8 + $0x174] ss:$8 sps:$4 sm:$0xff]  }
  0x9d   :  { %1461 = vmatpush1.bf16.msra.mxu1 %v3416_v15  ;;  %827 = vmatprep.subr.bf16.mxu0 %v3421_v16  ;;  %v3508_v15 = vld [vmem:[#allocation8 + $0x274] ss:$8 sps:$4 sm:$0xff]   ;;  %v151_v16 = vpack.c.bf16 %v139_v12, %v139_v12 }
  0x9e   :  { %1462 = vmatprep.subr.bf16.mxu1 %v3424_v17  ;;  %v864_v17 = vpack.c.bf16 %v141_v13, %v141_v13  ;;  %v3589_v12 = vld [vmem:[#allocation8 + $0x194] ss:$8 sps:$4 sm:$0xff]  }
  0x9f   :  { %v3592_v13 = vld [vmem:[#allocation8 + $0x294] ss:$8 sps:$4 sm:$0xff]  }
  0xa0   :  { %828 = vmatpush1.bf16.msra.mxu0 %v3419_v18  ;;  %v3503_v18 = vld [vmem:[#allocation8 + $0x170] ss:$8 sps:$4 sm:$0xff]  }
  0xa1   :  { %1463 = vmatpush1.bf16.msra.mxu1 %v3422_v19  ;;  %829 = vmatprep.subr.bf16.mxu0 %v3427_v20  ;;  %v3506_v19 = vld [vmem:[#allocation8 + $0x270] ss:$8 sps:$4 sm:$0xff]   ;;  %v3511_v20 = vld [vmem:[#allocation8 + $0x164] ss:$8 sps:$4 sm:$0xff]  }
  0xa2   :  { %1464 = vmatprep.subr.bf16.mxu1 %v3430_v21  ;;  %v3514_v21 = vld [vmem:[#allocation8 + $0x264] ss:$8 sps:$4 sm:$0xff]  }
  0xa4   :  { %830 = vmatpush1.bf16.msra.mxu0 %v3425_v22  ;;  %v3509_v22 = vld [vmem:[#allocation8 + $0x160] ss:$8 sps:$4 sm:$0xff]  }
  0xa5   :  { %1465 = vmatpush1.bf16.msra.mxu1 %v3428_v23  ;;  %831 = vmatprep.subr.bf16.mxu0 %v3433_v24  ;;  %v144_v23 = vld [vmem:[#allocation5 + $0x18] sm:$0xff] }
  0xa6   :  { %1466 = vmatprep.subr.bf16.mxu1 %v3436_v25  ;;  %v3512_v24 = vld [vmem:[#allocation8 + $0x260] ss:$8 sps:$4 sm:$0xff]   ;;  %v3517_v25 = vld [vmem:[#allocation8 + $0x154] ss:$8 sps:$4 sm:$0xff]  }
  0xa8   :  { %832 = vmatpush1.bf16.msra.mxu0 %v3431_v26  ;;  %v867_v26 = vpack.c.bf16 %v144_v23, %v144_v23 }
  0xa9   :  { %1467 = vmatpush1.bf16.msra.mxu1 %v3434_v27  ;;  %833 = vmatprep.subr.bf16.mxu0 %v3439_v28  ;;  %v146_v27 = vld [vmem:[#allocation5 + $0x28] sm:$0xff] }
  0xaa   :  { %1468 = vmatprep.subr.bf16.mxu1 %v3442_v29  ;;  %v3520_v28 = vld [vmem:[#allocation8 + $0x254] ss:$8 sps:$4 sm:$0xff]   ;;  %v869_v29 = vpack.c.bf16 %v146_v27, %v146_v27  ;;  %v249_v27 = vld [vmem:[%s4130_s3] sm:$0x3] }
  0xac   :  { %834 = vmatpush1.bf16.msra.mxu0 %v3437_v30  ;;  %v3515_v30 = vld [vmem:[#allocation8 + $0x150] ss:$8 sps:$4 sm:$0xff]  }
  0xad   :  { %1469 = vmatpush1.bf16.msra.mxu1 %v3440_v31  ;;  %835 = vmatprep.subr.bf16.mxu0 %v3445_v32  ;;  %v3518_v31 = vld [vmem:[#allocation8 + $0x250] ss:$8 sps:$4 sm:$0xff]   ;;  %v3523_v32 = vld [vmem:[#allocation8 + $0x144] ss:$8 sps:$4 sm:$0xff]  }
  0xae   :  { %1470 = vmatprep.subr.bf16.mxu1 %v3448_v33  ;;  %v3526_v33 = vld [vmem:[#allocation8 + $0x244] ss:$8 sps:$4 sm:$0xff]  }
  0xb0   :  { %836 = vmatpush1.bf16.msra.mxu0 %v3443_v35  ;;  %v3524_v35 = vld [vmem:[#allocation8 + $0x240] ss:$8 sps:$4 sm:$0xff]  }
  0xb1   :  { %1471 = vmatpush1.bf16.msra.mxu1 %v3446_v36  ;;  %837 = vmatprep.subr.bf16.mxu0 %v3451_v39  ;;  %v3529_v36 = vld [vmem:[#allocation8 + $0x134] ss:$8 sps:$4 sm:$0xff]   ;;  %v3530_v39 = vld [vmem:[#allocation8 + $0x230] ss:$8 sps:$4 sm:$0xff]  }
  0xb2   :  { %1472 = vmatprep.subr.bf16.mxu1 %v3454_v41  ;;  %v3538_v41 = vld [vmem:[#allocation8 + $0x224] ss:$8 sps:$4 sm:$0xff]  }
  0xb4   :  { %838 = vmatpush1.bf16.msra.mxu0 %v3449_v42  ;;  %v3533_v42 = vld [vmem:[#allocation8 + $0x120] ss:$8 sps:$4 sm:$0xff]  }
  0xb5   :  { %1473 = vmatpush1.bf16.msra.mxu1 %v3452_v43  ;;  %839 = vmatprep.subr.bf16.mxu0 %v3457_v44  ;;  %v3536_v43 = vld [vmem:[#allocation8 + $0x220] ss:$8 sps:$4 sm:$0xff]   ;;  %v3541_v44 = vld [vmem:[#allocation8 + $0x114] ss:$8 sps:$4 sm:$0xff]  }
  0xb6   :  { %1474 = vmatprep.subr.bf16.mxu1 %v3460_v45  ;;  %v3544_v45 = vld [vmem:[#allocation8 + $0x214] ss:$8 sps:$4 sm:$0xff]  }
  0xb8   :  { %840 = vmatpush2.bf16.msra.mxu0 %v3455_v46  ;;  %v3539_v46 = vld [vmem:[#allocation8 + $0x110] ss:$8 sps:$4 sm:$0xff]  }
  0xb9   :  { %1475 = vmatpush2.bf16.msra.mxu1 %v3458_v47  ;;  %841 = vmatprep.subr.bf16.mxu0 %v3463_v48  ;;  %v3542_v47 = vld [vmem:[#allocation8 + $0x210] ss:$8 sps:$4 sm:$0xff]   ;;  %v3547_v48 = vld [vmem:[#allocation8 + $0x104] ss:$8 sps:$4 sm:$0xff]  }
  0xba   :  { %1476 = vmatprep.subr.bf16.mxu1 %v3466_v49  ;;  %v3550_v49 = vld [vmem:[#allocation8 + $0x204] ss:$8 sps:$4 sm:$0xff]  }
  0xbc   :  { %842 = vmatpush2.bf16.msra.mxu0 %v3461_v50  ;;  %v3545_v50 = vld [vmem:[#allocation8 + $0x100] ss:$8 sps:$4 sm:$0xff]  }
  0xbd   :  { %1477 = vmatpush2.bf16.msra.mxu1 %v3464_v51  ;;  %843 = vmatprep.subr.bf16.mxu0 %v3469_v52  ;;  %v3548_v51 = vld [vmem:[#allocation8 + $0x200] ss:$8 sps:$4 sm:$0xff]   ;;  %v3553_v52 = vld [vmem:[#allocation8 + $0x1f4] ss:$8 sps:$4 sm:$0xff]  }
  0xbe   :  { %1478 = vmatprep.subr.bf16.mxu1 %v3472_v53  ;;  %v3556_v53 = vld [vmem:[#allocation8 + $0x2f4] ss:$8 sps:$4 sm:$0xff]  }
  0xc0   :  { %844 = vmatpush2.bf16.msra.mxu0 %v3467_v54  ;;  %v3551_v54 = vld [vmem:[#allocation8 + $0x1f0] ss:$8 sps:$4 sm:$0xff]  }
  0xc1   :  { %1479 = vmatpush2.bf16.msra.mxu1 %v3470_v55  ;;  %845 = vmatprep.subr.bf16.mxu0 %v3475_v56  ;;  %v3554_v55 = vld [vmem:[#allocation8 + $0x2f0] ss:$8 sps:$4 sm:$0xff]   ;;  %v3559_v56 = vld [vmem:[#allocation8 + $0x1e4] ss:$8 sps:$4 sm:$0xff]  }
  0xc2   :  { %1480 = vmatprep.subr.bf16.mxu1 %v3478_v57  ;;  %v3562_v57 = vld [vmem:[#allocation8 + $0x2e4] ss:$8 sps:$4 sm:$0xff]  }
  0xc4   :  { %846 = vmatpush2.bf16.msra.mxu0 %v3473_v58  ;;  %v3557_v58 = vld [vmem:[#allocation8 + $0x1e0] ss:$8 sps:$4 sm:$0xff]  }
  0xc5   :  { %1481 = vmatpush2.bf16.msra.mxu1 %v3476_v59  ;;  %847 = vmatprep.subr.bf16.mxu0 %v3481_v60  ;;  %v3560_v59 = vld [vmem:[#allocation8 + $0x2e0] ss:$8 sps:$4 sm:$0xff]   ;;  %v3565_v60 = vld [vmem:[#allocation8 + $0x1d4] ss:$8 sps:$4 sm:$0xff]  }
  0xc6   :  { %1482 = vmatprep.subr.bf16.mxu1 %v3484_v61  ;;  %v3568_v61 = vld [vmem:[#allocation8 + $0x2d4] ss:$8 sps:$4 sm:$0xff]  }
  0xc8   :  { %848 = vmatpush2.bf16.msra.mxu0 %v3479_v62  ;;  %v3563_v62 = vld [vmem:[#allocation8 + $0x1d0] ss:$8 sps:$4 sm:$0xff]  }
  0xc9   :  { %1483 = vmatpush2.bf16.msra.mxu1 %v3482_v63  ;;  %849 = vmatprep.subr.bf16.mxu0 %v3487_v0  ;;  %v3566_v63 = vld [vmem:[#allocation8 + $0x2d0] ss:$8 sps:$4 sm:$0xff]   ;;  %v3571_v0 = vld [vmem:[#allocation8 + $0x1c4] ss:$8 sps:$4 sm:$0xff]  }
  0xca   :  { %1484 = vmatprep.subr.bf16.mxu1 %v3490_v1  ;;  %v3574_v1 = vld [vmem:[#allocation8 + $0x2c4] ss:$8 sps:$4 sm:$0xff]  }
  0xcc   :  { %850 = vmatpush2.bf16.msra.mxu0 %v3485_v2  ;;  %v3569_v2 = vld [vmem:[#allocation8 + $0x1c0] ss:$8 sps:$4 sm:$0xff]  }
  0xcd   :  { %1485 = vmatpush2.bf16.msra.mxu1 %v3488_v3  ;;  %851 = vmatprep.subr.bf16.mxu0 %v3493_v4  ;;  %v3572_v3 = vld [vmem:[#allocation8 + $0x2c0] ss:$8 sps:$4 sm:$0xff]   ;;  %v3577_v4 = vld [vmem:[#allocation8 + $0x1b4] ss:$8 sps:$4 sm:$0xff]  }
  0xce   :  { %1486 = vmatprep.subr.bf16.mxu1 %v3496_v5  ;;  %v3580_v5 = vld [vmem:[#allocation8 + $0x2b4] ss:$8 sps:$4 sm:$0xff]  }
  0xd0   :  { %852 = vmatpush2.bf16.msra.mxu0 %v3491_v6  ;;  %v3575_v6 = vld [vmem:[#allocation8 + $0x1b0] ss:$8 sps:$4 sm:$0xff]  }
  0xd1   :  { %1487 = vmatpush2.bf16.msra.mxu1 %v3494_v7  ;;  %853 = vmatprep.subr.bf16.mxu0 %v3499_v8  ;;  %v3578_v7 = vld [vmem:[#allocation8 + $0x2b0] ss:$8 sps:$4 sm:$0xff]   ;;  %v3583_v8 = vld [vmem:[#allocation8 + $0x1a4] ss:$8 sps:$4 sm:$0xff]  }
  0xd2   :  { %1488 = vmatprep.subr.bf16.mxu1 %v3502_v9  ;;  %v3586_v9 = vld [vmem:[#allocation8 + $0x2a4] ss:$8 sps:$4 sm:$0xff]  }
  0xd4   :  { %854 = vmatpush2.bf16.msra.mxu0 %v3497_v10  ;;  %v3581_v10 = vld [vmem:[#allocation8 + $0x1a0] ss:$8 sps:$4 sm:$0xff]  }
  0xd5   :  { %1489 = vmatpush2.bf16.msra.mxu1 %v3500_v11  ;;  %1499 = vmatprep.subr.bf16.mxu0 %v3505_v14  ;;  %v3584_v11 = vld [vmem:[#allocation8 + $0x2a0] ss:$8 sps:$4 sm:$0xff]   ;;  %v3587_v14 = vld [vmem:[#allocation8 + $0x190] ss:$8 sps:$4 sm:$0xff]  }
  0xd6   :  { %1540 = vmatprep.subr.bf16.mxu1 %v3508_v15  ;;  %v3590_v15 = vld [vmem:[#allocation8 + $0x290] ss:$8 sps:$4 sm:$0xff]  }
  0xd7   :  { %856 = vmatmul.mubr.bf16.vlgmr.msra.gmra.mxu0 %v151_v16  ;;  %v3595_v16 = vld [vmem:[#allocation8 + $0x184] ss:$8 sps:$4 sm:$0xff]  }
  0xd8   :  { %1491 = vmatmul.mubr.bf16.vlgmr.msra.gmra.mxu1 %v864_v17  ;;  %1500 = vmatpush1.bf16.msra.mxu0 %v3503_v18  ;;  %v3598_v17 = vld [vmem:[#allocation8 + $0x284] ss:$8 sps:$4 sm:$0xff]   ;;  %v3593_v18 = vld [vmem:[#allocation8 + $0x180] ss:$8 sps:$4 sm:$0xff]  }
  0xd9   :  { %1541 = vmatpush1.bf16.msra.mxu1 %v3506_v19  ;;  %1501 = vmatprep.subr.bf16.mxu0 %v3511_v20  ;;  %v3596_v19 = vld [vmem:[#allocation8 + $0x280] ss:$8 sps:$4 sm:$0xff]  }
  0xda   :  { %1542 = vmatprep.subr.bf16.mxu1 %v3514_v21  ;;  %1531 = vmatprep.mubr.bf16.mxu0 %v867_v26  ;;  %v143_v20 = vld [vmem:[#allocation5 + $0x10] sm:$0xff]  ;;  %v145_v21 = vld [vmem:[#allocation5 + $0x20] sm:$0xff] }
  0xdb   :  { %1572 = vmatprep.mubr.bf16.mxu1 %v869_v29  ;;  %v868_v23 = vpack.c.bf16 %v145_v21, %v145_v21 }
  0xdc   :  { %1502 = vmatpush1.bf16.msra.mxu0 %v3509_v22  ;;  %v866_v22 = vpack.c.bf16 %v143_v20, %v143_v20 }
  0xdd   :  { %1543 = vmatpush1.bf16.msra.mxu1 %v3512_v24  ;;  %1503 = vmatprep.subr.bf16.mxu0 %v3517_v25  ;;  %v251_v24 = vlaneseq }
  0xde   :  { %1544 = vmatprep.subr.bf16.mxu1 %v3520_v28 }
  0xdf   :  { %v4053_v25 = vshrl.u32 %v251_v24, 7 }
  0xe0   :  { %1504 = vmatpush1.bf16.msra.mxu0 %v3515_v30 }
  0xe1   :  { %1545 = vmatpush1.bf16.msra.mxu1 %v3518_v31  ;;  %1505 = vmatprep.subr.bf16.mxu0 %v3523_v32  ;;  %v4056_v26 = vsub.s32 0, %v4053_v25  ;;  %v4062_v28 = vsub.s32 1, %v4053_v25 }
  0xe2   :  { %1546 = vmatprep.subr.bf16.mxu1 %v3526_v33 }
  0xe3   :  { %v254_v29 = vrot.slane %v249_v27, %v4056_v26  ;;  %v258_v30 = vrot.slane %v249_v27, %v4062_v28 }
  0xe4   :  { %1506 = vmatpush1.bf16.msra.mxu0 %v3521_v34 }
  0xe5   :  { %1547 = vmatpush1.bf16.msra.mxu1 %v3524_v35  ;;  %1507 = vmatprep.subr.bf16.mxu0 %v3529_v36 }
  0xe6   :  { %1548 = vmatprep.subr.bf16.mxu1 %v3532_v37 }
  0xe8   :  { %1508 = vmatpush1.bf16.msra.mxu0 %v3527_v38 }
  0xe9   :  { %1549 = vmatpush1.bf16.msra.mxu1 %v3530_v39  ;;  %1509 = vmatprep.subr.bf16.mxu0 %v3535_v40 }
  0xea   :  { %1550 = vmatprep.subr.bf16.mxu1 %v3538_v41 }
  0xec   :  { %1510 = vmatpush1.bf16.msra.mxu0 %v3533_v42 }
  0xed   :  { %1551 = vmatpush1.bf16.msra.mxu1 %v3536_v43  ;;  %1511 = vmatprep.subr.bf16.mxu0 %v3541_v44  ;;  %v3599_v43 = vld [vmem:[#allocation10 + $0x150] ss:$24 sps:$4 sm:$0xff]   ;;  %v3601_v44 = vld [vmem:[#allocation10 + $0x154] ss:$24 sps:$4 sm:$0xff]  }
  0xee   :  { %1552 = vmatprep.subr.bf16.mxu1 %v3544_v45  ;;  %v3602_v45 = vld [vmem:[#allocation10 + $0x158] ss:$24 sps:$4 sm:$0xff]  }
  0xf0   :  { %1512 = vmatpush1.bf16.msra.mxu0 %v3539_v46  ;;  %v3604_v46 = vld [vmem:[#allocation10 + $0x15c] ss:$24 sps:$4 sm:$0xff]  }
  0xf1   :  { %1553 = vmatpush1.bf16.msra.mxu1 %v3542_v47  ;;  %1513 = vmatprep.subr.bf16.mxu0 %v3547_v48  ;;  %v3607_v47 = vld [vmem:[#allocation10 + $0x124] ss:$24 sps:$4 sm:$0xff]  }
  0xf2   :  { %1554 = vmatprep.subr.bf16.mxu1 %v3550_v49  ;;  %v3610_v48 = vld [vmem:[#allocation10 + $0x12c] ss:$24 sps:$4 sm:$0xff]   ;;  %v3605_v49 = vld [vmem:[#allocation10 + $0x120] ss:$24 sps:$4 sm:$0xff]  }
  0xf4   :  { %1514 = vmatpush1.bf16.msra.mxu0 %v3545_v50  ;;  %v3608_v50 = vld [vmem:[#allocation10 + $0x128] ss:$24 sps:$4 sm:$0xff]  }
  0xf5   :  { %1555 = vmatpush1.bf16.msra.mxu1 %v3548_v51  ;;  %1515 = vmatprep.subr.bf16.mxu0 %v3553_v52  ;;  %v3613_v51 = vld [vmem:[#allocation10 + $0xf4] ss:$24 sps:$4 sm:$0xff]  }
  0xf6   :  { %1556 = vmatprep.subr.bf16.mxu1 %v3556_v53  ;;  %v3616_v52 = vld [vmem:[#allocation10 + $0xfc] ss:$24 sps:$4 sm:$0xff]   ;;  %v3611_v53 = vld [vmem:[#allocation10 + $0xf0] ss:$24 sps:$4 sm:$0xff]  }
  0xf8   :  { %1516 = vmatpush2.bf16.msra.mxu0 %v3551_v54  ;;  %v3614_v54 = vld [vmem:[#allocation10 + $0xf8] ss:$24 sps:$4 sm:$0xff]  }
  0xf9   :  { %1557 = vmatpush2.bf16.msra.mxu1 %v3554_v55  ;;  %1517 = vmatprep.subr.bf16.mxu0 %v3559_v56  ;;  %v3619_v55 = vld [vmem:[#allocation10 + $0xc4] ss:$24 sps:$4 sm:$0xff]  }
  0xfa   :  { %1558 = vmatprep.subr.bf16.mxu1 %v3562_v57  ;;  %v3622_v56 = vld [vmem:[#allocation10 + $0xcc] ss:$24 sps:$4 sm:$0xff]   ;;  %v3617_v57 = vld [vmem:[#allocation10 + $0xc0] ss:$24 sps:$4 sm:$0xff]  }
  0xfc   :  { %1518 = vmatpush2.bf16.msra.mxu0 %v3557_v58  ;;  %v3620_v58 = vld [vmem:[#allocation10 + $0xc8] ss:$24 sps:$4 sm:$0xff]  }
  0xfd   :  { %1559 = vmatpush2.bf16.msra.mxu1 %v3560_v59  ;;  %1519 = vmatprep.subr.bf16.mxu0 %v3565_v60  ;;  %v3625_v59 = vld [vmem:[#allocation10 + $0x94] ss:$24 sps:$4 sm:$0xff]  }
  0xfe   :  { %1560 = vmatprep.subr.bf16.mxu1 %v3568_v61  ;;  %v3628_v60 = vld [vmem:[#allocation10 + $0x9c] ss:$24 sps:$4 sm:$0xff]   ;;  %v3623_v61 = vld [vmem:[#allocation10 + $0x90] ss:$24 sps:$4 sm:$0xff]  }
 0x100   :  { %1520 = vmatpush2.bf16.msra.mxu0 %v3563_v62  ;;  %v3626_v62 = vld [vmem:[#allocation10 + $0x98] ss:$24 sps:$4 sm:$0xff]  }
 0x101   :  { %1561 = vmatpush2.bf16.msra.mxu1 %v3566_v63  ;;  %1521 = vmatprep.subr.bf16.mxu0 %v3571_v0  ;;  %v3631_v63 = vld [vmem:[#allocation10 + $0x64] ss:$24 sps:$4 sm:$0xff]  }
 0x102   :  { %1562 = vmatprep.subr.bf16.mxu1 %v3574_v1  ;;  %v3634_v0 = vld [vmem:[#allocation10 + $0x6c] ss:$24 sps:$4 sm:$0xff]   ;;  %v3629_v1 = vld [vmem:[#allocation10 + $0x60] ss:$24 sps:$4 sm:$0xff]  }
 0x104   :  { %1522 = vmatpush2.bf16.msra.mxu0 %v3569_v2  ;;  %v3632_v2 = vld [vmem:[#allocation10 + $0x68] ss:$24 sps:$4 sm:$0xff]  }
 0x105   :  { %1563 = vmatpush2.bf16.msra.mxu1 %v3572_v3  ;;  %1523 = vmatprep.subr.bf16.mxu0 %v3577_v4 }
 0x106   :  { %1564 = vmatprep.subr.bf16.mxu1 %v3580_v5 }
 0x108   :  { %1524 = vmatpush2.bf16.msra.mxu0 %v3575_v6 }
 0x109   :  { %1565 = vmatpush2.bf16.msra.mxu1 %v3578_v7  ;;  %1525 = vmatprep.subr.bf16.mxu0 %v3583_v8 }
 0x10a   :  { %1566 = vmatprep.subr.bf16.mxu1 %v3586_v9 }
 0x10c   :  { %1526 = vmatpush2.bf16.msra.mxu0 %v3581_v10 }
 0x10d   :  { %1567 = vmatpush2.bf16.msra.mxu1 %v3584_v11  ;;  %1527 = vmatprep.subr.bf16.mxu0 %v3589_v12 }
 0x10e   :  { %1568 = vmatprep.subr.bf16.mxu1 %v3592_v13  ;;  %v966_v13 = vld [vmem:[%s4132_s5] sm:$0x3] }
 0x110   :  { %1528 = vmatpush2.bf16.msra.mxu0 %v3587_v14  ;;  %v971_v14 = vrot.slane %v966_v13, %v4056_v26 }
 0x111   :  { %1569 = vmatpush2.bf16.msra.mxu1 %v3590_v15  ;;  %1529 = vmatprep.subr.bf16.mxu0 %v3595_v16  ;;  %v975_v15 = vrot.slane %v966_v13, %v4062_v28  ;;  %v1595_v16 = vld [vmem:[%s4134_s7] sm:$0x3]  ;;  %v3682_v13 = vld [vmem:[#allocation10 + $0x1ec] ss:$24 sps:$4 sm:$0xff]  }
 0x112   :  { %1570 = vmatprep.subr.bf16.mxu1 %v3598_v17  ;;  %v1581_v17 = vld [vmem:[%s4133_s6] sm:$0x3] }
 0x113   :  { %v1586_v24 = vrot.slane %v1581_v17, %v4056_v26 }
 0x114   :  { %1530 = vmatpush2.bf16.msra.mxu0 %v3593_v18 }
 0x115   :  { %1571 = vmatpush2.bf16.msra.mxu1 %v3596_v19  ;;  %2239 = vmatprep.subr.bf16.mxu0 %v3601_v44 }
 0x116   :  { %2280 = vmatprep.subr.bf16.mxu1 %v3604_v46  ;;  %v3637_v46 = vld [vmem:[#allocation10 + $0x34] ss:$24 sps:$4 sm:$0xff]  }
 0x117   :  { %1532 = vmatmul.mubr.bf16.vlgmr.msra.gmra.mxu0 %v866_v22 }
 0x118   :  { %1573 = vmatmul.mubr.bf16.vlgmr.msra.gmra.mxu1 %v868_v23  ;;  %2240 = vmatpush1.bf16.msra.mxu0 %v3599_v43  ;;  %v1600_v23 = vrot.slane %v1595_v16, %v4056_v26 }
 0x119   :  { %2281 = vmatpush1.bf16.msra.mxu1 %v3602_v45  ;;  %2241 = vmatprep.subr.bf16.mxu0 %v3607_v47  ;;  %v3635_v47 = vld [vmem:[#allocation10 + $0x30] ss:$24 sps:$4 sm:$0xff]  }
 0x11a   :  { %2282 = vmatprep.subr.bf16.mxu1 %v3610_v48  ;;  %v3640_v48 = vld [vmem:[#allocation10 + $0x3c] ss:$24 sps:$4 sm:$0xff]  }
 0x11c   :  { %2242 = vmatpush1.bf16.msra.mxu0 %v3605_v49  ;;  %v3638_v49 = vld [vmem:[#allocation10 + $0x38] ss:$24 sps:$4 sm:$0xff]  }
 0x11d   :  { %2283 = vmatpush1.bf16.msra.mxu1 %v3608_v50  ;;  %2243 = vmatprep.subr.bf16.mxu0 %v3613_v51  ;;  %v3643_v50 = vld [vmem:[#allocation10 + $0x4] ss:$24 sps:$4 sm:$0xff]   ;;  %v3641_v51 = vld [vmem:[#allocation10] ss:$24 sps:$4 sm:$0xff]  }
 0x11e   :  { %2284 = vmatprep.subr.bf16.mxu1 %v3616_v52  ;;  %v3646_v52 = vld [vmem:[#allocation10 + $0xc] ss:$24 sps:$4 sm:$0xff]  }
 0x120   :  { %2244 = vmatpush1.bf16.msra.mxu0 %v3611_v53  ;;  %v3644_v53 = vld [vmem:[#allocation10 + $0x8] ss:$24 sps:$4 sm:$0xff]  }
 0x121   :  { %2285 = vmatpush1.bf16.msra.mxu1 %v3614_v54  ;;  %2245 = vmatprep.subr.bf16.mxu0 %v3619_v55  ;;  %v3649_v54 = vld [vmem:[#allocation10 + $0x2d4] ss:$24 sps:$4 sm:$0xff]   ;;  %v3647_v55 = vld [vmem:[#allocation10 + $0x2d0] ss:$24 sps:$4 sm:$0xff]  }
 0x122   :  { %2286 = vmatprep.subr.bf16.mxu1 %v3622_v56  ;;  %v3652_v56 = vld [vmem:[#allocation10 + $0x2dc] ss:$24 sps:$4 sm:$0xff]  }
 0x124   :  { %2246 = vmatpush1.bf16.msra.mxu0 %v3617_v57  ;;  %v3650_v57 = vld [vmem:[#allocation10 + $0x2d8] ss:$24 sps:$4 sm:$0xff]  }
 0x125   :  { %2287 = vmatpush1.bf16.msra.mxu1 %v3620_v58  ;;  %2247 = vmatprep.subr.bf16.mxu0 %v3625_v59  ;;  %v3655_v58 = vld [vmem:[#allocation10 + $0x2a4] ss:$24 sps:$4 sm:$0xff]   ;;  %v3653_v59 = vld [vmem:[#allocation10 + $0x2a0] ss:$24 sps:$4 sm:$0xff]  }
 0x126   :  { %2288 = vmatprep.subr.bf16.mxu1 %v3628_v60  ;;  %v3658_v60 = vld [vmem:[#allocation10 + $0x2ac] ss:$24 sps:$4 sm:$0xff]  }
 0x128   :  { %2248 = vmatpush1.bf16.msra.mxu0 %v3623_v61  ;;  %v3656_v61 = vld [vmem:[#allocation10 + $0x2a8] ss:$24 sps:$4 sm:$0xff]  }
 0x129   :  { %2289 = vmatpush1.bf16.msra.mxu1 %v3626_v62  ;;  %2249 = vmatprep.subr.bf16.mxu0 %v3631_v63  ;;  %v3661_v62 = vld [vmem:[#allocation10 + $0x274] ss:$24 sps:$4 sm:$0xff]   ;;  %v3659_v63 = vld [vmem:[#allocation10 + $0x270] ss:$24 sps:$4 sm:$0xff]  }
 0x12a   :  { %2290 = vmatprep.subr.bf16.mxu1 %v3634_v0  ;;  %v3664_v0 = vld [vmem:[#allocation10 + $0x27c] ss:$24 sps:$4 sm:$0xff]  }
 0x12c   :  { %2250 = vmatpush1.bf16.msra.mxu0 %v3629_v1  ;;  %v3662_v1 = vld [vmem:[#allocation10 + $0x278] ss:$24 sps:$4 sm:$0xff]  }
 0x12d   :  { %2291 = vmatpush1.bf16.msra.mxu1 %v3632_v2  ;;  %2251 = vmatprep.subr.bf16.mxu0 %v3637_v46  ;;  %v3667_v2 = vld [vmem:[#allocation10 + $0x244] ss:$24 sps:$4 sm:$0xff]  }
 0x12e   :  { %2292 = vmatprep.subr.bf16.mxu1 %v3640_v48  ;;  %v3744_v48 = vld [vmem:[#allocation13 + $0x38] sm:$0xff]  }
 0x130   :  { %2252 = vmatpush1.bf16.msra.mxu0 %v3635_v47  ;;  %v3700_v47 = vld [vmem:[#allocation10 + $0x134] ss:$24 sps:$4 sm:$0xff]  }
 0x131   :  { %2293 = vmatpush1.bf16.msra.mxu1 %v3638_v49  ;;  %2253 = vmatprep.subr.bf16.mxu0 %v3643_v50  ;;  %v3745_v49 = vld [vmem:[#allocation13 + $0x70] sm:$0xff]  }
 0x132   :  { %2294 = vmatprep.subr.bf16.mxu1 %v3646_v52  ;;  %v3701_v50 = vld [vmem:[#allocation10 + $0x100] ss:$24 sps:$4 sm:$0xff]   ;;  %v3748_v52 = vld [vmem:[#allocation13 + $0x28] sm:$0xff]  }
 0x134   :  { %2254 = vmatpush1.bf16.msra.mxu0 %v3641_v51  ;;  %v3706_v51 = vld [vmem:[#allocation10 + $0xd4] ss:$24 sps:$4 sm:$0xff]  }
 0x135   :  { %2295 = vmatpush1.bf16.msra.mxu1 %v3644_v53  ;;  %2255 = vmatprep.subr.bf16.mxu0 %v3649_v54  ;;  %v3749_v53 = vld [vmem:[#allocation13 + $0x60] sm:$0xff]  }
 0x136   :  { %2296 = vmatprep.subr.bf16.mxu1 %v3652_v56  ;;  %v3704_v54 = vld [vmem:[#allocation10 + $0xd0] ss:$24 sps:$4 sm:$0xff]  }
 0x137   :  { %v3750_v56 = vld [vmem:[#allocation13 + $0x20] sm:$0xff]  }
 0x138   :  { %2256 = vmatpush2.bf16.msra.mxu0 %v3647_v55  ;;  %v3709_v55 = vld [vmem:[#allocation10 + $0xa4] ss:$24 sps:$4 sm:$0xff]  }
 0x139   :  { %2297 = vmatpush2.bf16.msra.mxu1 %v3650_v57  ;;  %2257 = vmatprep.subr.bf16.mxu0 %v3655_v58  ;;  %v3751_v57 = vld [vmem:[#allocation13 + $0x58] sm:$0xff]  }
 0x13a   :  { %2298 = vmatprep.subr.bf16.mxu1 %v3658_v60  ;;  %v3707_v58 = vld [vmem:[#allocation10 + $0xa0] ss:$24 sps:$4 sm:$0xff]  }
 0x13b   :  { %v3752_v60 = vld [vmem:[#allocation13 + $0x18] sm:$0xff]  }
 0x13c   :  { %2258 = vmatpush2.bf16.msra.mxu0 %v3653_v59  ;;  %v3712_v59 = vld [vmem:[#allocation10 + $0x74] ss:$24 sps:$4 sm:$0xff]  }
 0x13d   :  { %2299 = vmatpush2.bf16.msra.mxu1 %v3656_v61  ;;  %2259 = vmatprep.subr.bf16.mxu0 %v3661_v62  ;;  %v3753_v61 = vld [vmem:[#allocation13 + $0x50] sm:$0xff]   ;;  %v3710_v62 = vld [vmem:[#allocation10 + $0x70] ss:$24 sps:$4 sm:$0xff]  }
 0x13e   :  { %2300 = vmatprep.subr.bf16.mxu1 %v3664_v0  ;;  %v3754_v0 = vld [vmem:[#allocation13 + $0x10] sm:$0xff]  }
 0x140   :  { %2260 = vmatpush2.bf16.msra.mxu0 %v3659_v63  ;;  %v3715_v63 = vld [vmem:[#allocation10 + $0x44] ss:$24 sps:$4 sm:$0xff]  }
 0x141   :  { %2301 = vmatpush2.bf16.msra.mxu1 %v3662_v1  ;;  %2261 = vmatprep.subr.bf16.mxu0 %v3667_v2  ;;  %v3713_v1 = vld [vmem:[#allocation10 + $0x40] ss:$24 sps:$4 sm:$0xff]   ;;  %v3718_v2 = vld [vmem:[#allocation10 + $0x14] ss:$24 sps:$4 sm:$0xff]  }
 0x157   :  { %v775_v31 = vpop.f32.mrf.mxu0 }
 0x158   :  { %v816_v32 = vpop.f32.mrf.mxu1  ;;  %v776_v33 = vadd.f32 %v775_v31, %v254_v29 }
 0x159   :  { %v777_v34 = vpop.f32.mrf.mxu0 }
 0x15a   :  { %v818_v35 = vpop.f32.mrf.mxu1  ;;  %v817_v36 = vadd.f32 %v816_v32, %v776_v33  ;;  %v778_v37 = vadd.f32 %v777_v34, %v258_v30  ;;  %v1590_v30 = vrot.slane %v1581_v17, %v4062_v28  ;;  %v1604_v33 = vrot.slane %v1595_v16, %v4062_v28  ;;  %v3685_v16 = vld [vmem:[#allocation10 + $0x1b4] ss:$24 sps:$4 sm:$0xff]  }
 0x15b   :  { %v779_v38 = vpop.f32.mrf.mxu0  ;;  %v3688_v17 = vld [vmem:[#allocation10 + $0x1bc] ss:$24 sps:$4 sm:$0xff]  }
 0x15c   :  { %v820_v39 = vpop.f32.mrf.mxu1  ;;  %v819_v40 = vadd.f32 %v818_v35, %v778_v37 }
 0x15d   :  { %v780_v41 = vpop.f32.mrf.mxu0 }
 0x15e   :  { %v821_v42 = vpop.f32.mrf.mxu1 }
 0x197   :  { %v857_v3 = vpop.f32.mrf.mxu0 }
 0x198   :  { %v1492_v4 = vpop.f32.mrf.mxu1  ;;  %v4066_v5 = vadd.f32 %v857_v3, %v817_v36  ;;  %v3665_v3 = vld [vmem:[#allocation10 + $0x240] ss:$24 sps:$4 sm:$0xff]  }
 0x199   :  { %v859_v6 = vpop.f32.mrf.mxu0  ;;  %v1493_v18 = vadd.f32 %v1492_v4, %v971_v14  ;;  %v3670_v4 = vld [vmem:[#allocation10 + $0x24c] ss:$24 sps:$4 sm:$0xff]   ;;  %2262 = vmatpush2.bf16.msra.mxu0 %v3665_v3  ;;  %v3677_v14 = vld [vmem:[#allocation10 + $0x1e0] ss:$24 sps:$4 sm:$0xff]   ;;  %v3716_v3 = vld [vmem:[#allocation10 + $0x10] ss:$24 sps:$4 sm:$0xff]  }
 0x19a   :  { %v1494_v7 = vpop.f32.mrf.mxu1  ;;  %v4068_v8 = vadd.f32 %v859_v6, %v819_v40  ;;  %v1593_v40 = vmul.f32 %v1586_v24, %v4066_v5  ;;  %v3668_v6 = vld [vmem:[#allocation10 + $0x248] ss:$24 sps:$4 sm:$0xff]   ;;  %2302 = vmatprep.subr.bf16.mxu1 %v3670_v4  ;;  %v3697_v24 = vld [vmem:[#allocation10 + $0x164] ss:$24 sps:$4 sm:$0xff]  }
 0x19b   :  { %v861_v9 = vpop.f32.mrf.mxu0  ;;  %v1495_v21 = vadd.f32 %v1494_v7, %v975_v15  ;;  %v3673_v7 = vld [vmem:[#allocation10 + $0x214] ss:$24 sps:$4 sm:$0xff]   ;;  %2303 = vmatpush2.bf16.msra.mxu1 %v3668_v6  ;;  %v3680_v15 = vld [vmem:[#allocation10 + $0x1e8] ss:$24 sps:$4 sm:$0xff]   ;;  %v3721_v4 = vld [vmem:[#allocation10 + $0x2e4] ss:$24 sps:$4 sm:$0xff]  }
 0x19c   :  { %v1496_v10 = vpop.f32.mrf.mxu1  ;;  %v1594_v41 = vmul.f32 %v1590_v30, %v4068_v8  ;;  %v3671_v9 = vld [vmem:[#allocation10 + $0x210] ss:$24 sps:$4 sm:$0xff]   ;;  %2263 = vmatprep.subr.bf16.mxu0 %v3673_v7  ;;  %v3719_v6 = vld [vmem:[#allocation10 + $0x2e0] ss:$24 sps:$4 sm:$0xff]   ;;  %v3724_v7 = vld [vmem:[#allocation10 + $0x2b4] ss:$24 sps:$4 sm:$0xff]  }
 0x19d   :  { %v862_v11 = vpop.f32.mrf.mxu0  ;;  %v3676_v10 = vld [vmem:[#allocation10 + $0x21c] ss:$24 sps:$4 sm:$0xff]   ;;  %2264 = vmatpush2.bf16.msra.mxu0 %v3671_v9  ;;  %v3722_v9 = vld [vmem:[#allocation10 + $0x2b0] ss:$24 sps:$4 sm:$0xff]  }
 0x19e   :  { %v1497_v12 = vpop.f32.mrf.mxu1  ;;  %v3674_v11 = vld [vmem:[#allocation10 + $0x218] ss:$24 sps:$4 sm:$0xff]   ;;  %2304 = vmatprep.subr.bf16.mxu1 %v3676_v10  ;;  %v3727_v10 = vld [vmem:[#allocation10 + $0x284] ss:$24 sps:$4 sm:$0xff]  }
 0x19f   :  { %v3679_v12 = vld [vmem:[#allocation10 + $0x1e4] ss:$24 sps:$4 sm:$0xff]   ;;  %2305 = vmatpush2.bf16.msra.mxu1 %v3674_v11  ;;  %v3725_v11 = vld [vmem:[#allocation10 + $0x280] ss:$24 sps:$4 sm:$0xff]  }
 0x1a0   :  { %2265 = vmatprep.subr.bf16.mxu0 %v3679_v12  ;;  %2306 = vmatprep.subr.bf16.mxu1 %v3682_v13  ;;  %v3730_v12 = vld [vmem:[#allocation10 + $0x254] ss:$24 sps:$4 sm:$0xff]   ;;  %v3728_v13 = vld [vmem:[#allocation10 + $0x250] ss:$24 sps:$4 sm:$0xff]  }
 0x1a1   :  { %2266 = vmatpush2.bf16.msra.mxu0 %v3677_v14  ;;  %v3733_v14 = vld [vmem:[#allocation10 + $0x224] ss:$24 sps:$4 sm:$0xff]  }
 0x1a2   :  { %2267 = vmatprep.subr.bf16.mxu0 %v3685_v16  ;;  %v3736_v16 = vld [vmem:[#allocation10 + $0x1f4] ss:$24 sps:$4 sm:$0xff]  }
 0x1a3   :  { %2307 = vmatpush2.bf16.msra.mxu1 %v3680_v15  ;;  %v3731_v15 = vld [vmem:[#allocation10 + $0x220] ss:$24 sps:$4 sm:$0xff]  }
 0x1a4   :  { %2308 = vmatprep.subr.bf16.mxu1 %v3688_v17  ;;  %v3734_v17 = vld [vmem:[#allocation10 + $0x1f0] ss:$24 sps:$4 sm:$0xff]  }
 0x1d7   :  { %v1533_v19 = vpop.f32.mrf.mxu0 }
 0x1d8   :  { %v1574_v20 = vpop.f32.mrf.mxu1  ;;  %v1534_v22 = vadd.f32 %v1533_v19, %v1493_v18  ;;  %v3683_v18 = vld [vmem:[#allocation10 + $0x1b0] ss:$24 sps:$4 sm:$0xff]  }
 0x1d9   :  { %v1535_v27 = vpop.f32.mrf.mxu0  ;;  %v3686_v19 = vld [vmem:[#allocation10 + $0x1b8] ss:$24 sps:$4 sm:$0xff]   ;;  %2268 = vmatpush2.bf16.msra.mxu0 %v3683_v18  ;;  %v3739_v18 = vld [vmem:[#allocation10 + $0x1c4] ss:$24 sps:$4 sm:$0xff]  }
 0x1da   :  { %v1576_v29 = vpop.f32.mrf.mxu1  ;;  %v4084_v31 = vadd.f32 %v1574_v20, %v1534_v22  ;;  %v1536_v32 = vadd.f32 %v1535_v27, %v1495_v21  ;;  %v3691_v20 = vld [vmem:[#allocation10 + $0x184] ss:$24 sps:$4 sm:$0xff]   ;;  %v3689_v22 = vld [vmem:[#allocation10 + $0x180] ss:$24 sps:$4 sm:$0xff]   ;;  %2309 = vmatpush2.bf16.msra.mxu1 %v3686_v19 }
 0x1db   :  { %v1537_v34 = vpop.f32.mrf.mxu0  ;;  %v3694_v21 = vld [vmem:[#allocation10 + $0x18c] ss:$24 sps:$4 sm:$0xff]   ;;  %2269 = vmatprep.subr.bf16.mxu0 %v3691_v20  ;;  %v3737_v19 = vld [vmem:[#allocation10 + $0x1c0] ss:$24 sps:$4 sm:$0xff]  }
 0x1dc   :  { %v1578_v35 = vpop.f32.mrf.mxu1  ;;  %v4087_v36 = vadd.f32 %v1576_v29, %v1536_v32  ;;  %v1607_v37 = vmul.f32 %v1600_v23, %v4084_v31  ;;  %v3692_v23 = vld [vmem:[#allocation10 + $0x188] ss:$24 sps:$4 sm:$0xff]   ;;  %2310 = vmatprep.subr.bf16.mxu1 %v3694_v21  ;;  %v1615_v29 = vstv %s4135_s8  ;;  %v3742_v20 = vld [vmem:[#allocation10 + $0x194] ss:$24 sps:$4 sm:$0xff]  }
 0x1dd   :  { %v1538_v38 = vpop.f32.mrf.mxu0  ;;  %2270 = vmatpush2.bf16.msra.mxu0 %v3689_v22  ;;  %v3743_v27 = vld [vmem:[#allocation13 + $0x78] sm:$0xff]   ;;  %v3740_v21 = vld [vmem:[#allocation10 + $0x190] ss:$24 sps:$4 sm:$0xff]  }
 0x1de   :  { %v1579_v39 = vpop.f32.mrf.mxu1  ;;  %v1608_v42 = vmul.f32 %v1604_v33, %v4087_v36  ;;  %v1609_v43 = vadd.f32 %v1607_v37, %v1593_v40  ;;  %2311 = vmatpush2.bf16.msra.mxu1 %v3692_v23  ;;  %2321 = vmatprep.subr.bf16.mxu0 %v3697_v24  ;;  %v1623_v37 = vsub.f32 %v4066_v5, %v4084_v31  ;;  %v3698_v5 = vld [vmem:[#allocation10 + $0x130] ss:$24 sps:$4 sm:$0xff]  }
 0x1df   :  { %3232 = vmatprep.subr.bf16.mxu1 %v3743_v27  ;;  %v1624_v38 = vsub.f32 %v4068_v8, %v4087_v36  ;;  %v3703_v8 = vld [vmem:[#allocation10 + $0x104] ss:$24 sps:$4 sm:$0xff]   ;;  %v3755_v22 = vld [vmem:[#allocation13 + $0x48] sm:$0xff]  }
 0x1e0   :  { %v1610_v44 = vadd.f32 %v1608_v42, %v1594_v41  ;;  %v3756_v23 = vld [vmem:[#allocation13 + $0x8] sm:$0xff]   ;;  %v3757_v24 = vld [vmem:[#allocation13 + $0x40] sm:$0xff]  }
 0x1e1   :  { %v3758_v27 = vld [vmem:[#allocation13] sm:$0xff]  }
 0x1e2   :  { %v1611_v45 = vadd.f32 %v1610_v44, %v1609_v43 }
 0x1e4   :  { %1612 = vadd.xlane.f32.xlu0 %v1611_v45  ;;  %v3695_v45 = vld [vmem:[#allocation10 + $0x160] ss:$24 sps:$4 sm:$0xff]  }
 0x26d   :  { %v1613_v30 = vpop.xlane.xlu0 %1612 }
 0x26e   :  { %v1616_v32 = vadd.f32 %v1615_v29, %v1613_v30  ;;  %v3759_v29 = vld [vmem:[#allocation13 + $0xf8] sm:$0xff]  }
 0x26f   :  { %v3775_v30 = vld [vmem:[#allocation13 + $0x178] sm:$0xff]  }
 0x270   :  { %v3086_v33 = vmul.f32 -1.442695, %v1616_v32  ;;  %v3776_v32 = vld [vmem:[#allocation13 + $0x138] sm:$0xff]  }
 0x272   :  { %3791 = vpow2.f32 %v3086_v33  ;;  %v3777_v33 = vld [vmem:[#allocation13 + $0x170] sm:$0xff]  }
 0x27f   :  { %v3792_v34 = vpop.eup %3791 }
 0x280   :  { %v1620_v35 = vadd.f32 1.0, %v3792_v34  ;;  %v3778_v34 = vld [vmem:[#allocation13 + $0x130] sm:$0xff]  }
 0x282   :  { %3793 = vrcp.f32 %v1620_v35  ;;  %v3779_v35 = vld [vmem:[#allocation13 + $0x168] sm:$0xff]  }
 0x28f   :  { %v3794_v39 = vpop.eup %3793 }
 0x290   :  { %v1626_v40 = vmul.f32 %v3794_v39, %v1624_v38  ;;  %v1625_v41 = vmul.f32 %v3794_v39, %v1623_v37  ;;  %v3780_v37 = vld [vmem:[#allocation13 + $0x128] sm:$0xff]   ;;  %v3781_v38 = vld [vmem:[#allocation13 + $0x160] sm:$0xff]  }
 0x291   :  { %v3782_v39 = vld [vmem:[#allocation13 + $0x120] sm:$0xff]  }
 0x292   :  { %v1628_v42 = vadd.f32 %v1626_v40, %v4087_v36  ;;  %v1627_v43 = vadd.f32 %v1625_v41, %v4084_v31  ;;  %v3746_v31 = vld [vmem:[#allocation13 + $0x30] sm:$0xff]   ;;  %v3747_v36 = vld [vmem:[#allocation13 + $0x68] sm:$0xff]   ;;  %v3783_v40 = vld [vmem:[#allocation13 + $0x158] sm:$0xff]  }
 0x293   :  { %v3784_v41 = vld [vmem:[#allocation13 + $0x118] sm:$0xff]  }
 0x294   :  { %v1630_v44 = vpack.c.bf16 %v1628_v42, %v1628_v42  ;;  %v4102_v46 = vpack.c.bf16 %v1627_v43, %v1627_v43  ;;  %v3785_v42 = vld [vmem:[#allocation13 + $0x150] sm:$0xff]  }
 0x295   :  { %v3786_v43 = vld [vmem:[#allocation13 + $0x110] sm:$0xff]  }
 0x296   :  { %2271 = vmatprep.mubr.bf16.mxu0 %v1630_v44  ;;  %2312 = vmatprep.mubr.bf16.mxu1 %v1630_v44 }
 0x297   :  { %2272 = vmatmul.mubr.bf16.vlgmr.msra.gmra.mxu0 %v4102_v46  ;;  %2313 = vmatmul.mubr.bf16.vlgmr.msra.gmra.mxu1 %v4102_v46 }
 0x298   :  { %2322 = vmatpush1.bf16.msra.mxu0 %v3695_v45  ;;  %2353 = vmatprep.mubr.bf16.mxu0 %v1630_v44  ;;  %v3787_v44 = vld [vmem:[#allocation13 + $0x148] sm:$0xff]  }
 0x299   :  { %2323 = vmatprep.subr.bf16.mxu0 %v3700_v47  ;;  %3233 = vmatpush3.bf16.msra.mxu1 %v3744_v48  ;;  %v3788_v45 = vld [vmem:[#allocation13 + $0x108] sm:$0xff]   ;;  %v3790_v47 = vld [vmem:[#allocation13 + $0x100] sm:$0xff]   ;;  %v4107_v48 = vld [vmem:[#allocation11] sm:$0x3f] }
 0x29a   :  { %3234 = vmatprep.subr.bf16.mxu1 %v3745_v49  ;;  %v1743_v49 = vsub.s32 3, %v4053_v25 }
 0x29c   :  { %2324 = vmatpush1.bf16.msra.mxu0 %v3698_v5  ;;  %v1732_v5 = vrot.slane %v4107_v48, %v4056_v26 }
 0x29d   :  { %2325 = vmatprep.subr.bf16.mxu0 %v3703_v8  ;;  %3235 = vmatpush3.bf16.msra.mxu1 %v3746_v31  ;;  %v1736_v8 = vrot.slane %v4107_v48, %v4062_v28  ;;  %v1744_v31 = vrot.slane %v4107_v48, %v1743_v49  ;;  %v3761_v28 = vld [vmem:[#allocation13 + $0xf0] sm:$0xff]   ;;  %v3183_v49 = vld [vmem:[%s4139_s12] ss:$0 sm:$0xff] }
 0x29e   :  { %3236 = vmatprep.subr.bf16.mxu1 %v3747_v36 }
 0x2a0   :  { %2326 = vmatpush1.bf16.msra.mxu0 %v3701_v50 }
 0x2a1   :  { %2327 = vmatprep.subr.bf16.mxu0 %v3706_v51  ;;  %3237 = vmatpush3.bf16.msra.mxu1 %v3748_v52 }
 0x2a2   :  { %3238 = vmatprep.subr.bf16.mxu1 %v3749_v53 }
 0x2a4   :  { %2328 = vmatpush1.bf16.msra.mxu0 %v3704_v54 }
 0x2a5   :  { %2329 = vmatprep.subr.bf16.mxu0 %v3709_v55  ;;  %3239 = vmatpush3.bf16.msra.mxu1 %v3750_v56 }
 0x2a6   :  { %3240 = vmatprep.subr.bf16.mxu1 %v3751_v57 }
 0x2a8   :  { %2330 = vmatpush1.bf16.msra.mxu0 %v3707_v58 }
 0x2a9   :  { %2331 = vmatprep.subr.bf16.mxu0 %v3712_v59  ;;  %3241 = vmatpush3.bf16.msra.mxu1 %v3752_v60 }
 0x2aa   :  { %3242 = vmatprep.subr.bf16.mxu1 %v3753_v61 }
 0x2ac   :  { %2332 = vmatpush1.bf16.msra.mxu0 %v3710_v62 }
 0x2ad   :  { %2333 = vmatprep.subr.bf16.mxu0 %v3715_v63  ;;  %3243 = vmatpush3.bf16.msra.mxu1 %v3754_v0  ;;  %v3760_v63 = vld [vmem:[#allocation13 + $0xb8] sm:$0xff]  }
 0x2ae   :  { %3244 = vmatprep.subr.bf16.mxu1 %v3755_v22  ;;  %v1747_v22 = vsub.s32 4, %v4053_v25 }
 0x2b0   :  { %2334 = vmatpush1.bf16.msra.mxu0 %v3713_v1 }
 0x2b1   :  { %2335 = vmatprep.subr.bf16.mxu0 %v3718_v2  ;;  %3245 = vmatpush3.bf16.msra.mxu1 %v3756_v23  ;;  %v3762_v2 = vld [vmem:[#allocation13 + $0xb0] sm:$0xff]   ;;  %v1751_v23 = vsub.s32 5, %v4053_v25 }
 0x2b2   :  { %3246 = vmatprep.subr.bf16.mxu1 %v3757_v24  ;;  %v1748_v24 = vrot.slane %v4107_v48, %v1747_v22 }
 0x2b4   :  { %2336 = vmatpush1.bf16.msra.mxu0 %v3716_v3  ;;  %v3763_v3 = vld [vmem:[#allocation13 + $0xe8] sm:$0xff]  }
 0x2b5   :  { %2337 = vmatprep.subr.bf16.mxu0 %v3721_v4  ;;  %3247 = vmatpush3.bf16.msra.mxu1 %v3758_v27  ;;  %v3764_v4 = vld [vmem:[#allocation13 + $0xa8] sm:$0xff]   ;;  %v1752_v27 = vrot.slane %v4107_v48, %v1751_v23 }
 0x2b6   :  { %3254 = vmatprep.subr.bf16.mxu1 %v3759_v29 }
 0x2b8   :  { %2338 = vmatpush2.bf16.msra.mxu0 %v3719_v6  ;;  %v3765_v6 = vld [vmem:[#allocation13 + $0xe0] sm:$0xff]  }
 0x2b9   :  { %2339 = vmatprep.subr.bf16.mxu0 %v3724_v7  ;;  %v3766_v7 = vld [vmem:[#allocation13 + $0xa0] sm:$0xff]  }
 0x2bc   :  { %2340 = vmatpush2.bf16.msra.mxu0 %v3722_v9  ;;  %v3767_v9 = vld [vmem:[#allocation13 + $0xd8] sm:$0xff]  }
 0x2bd   :  { %2341 = vmatprep.subr.bf16.mxu0 %v3727_v10  ;;  %v3768_v10 = vld [vmem:[#allocation13 + $0x98] sm:$0xff]  }
 0x2c0   :  { %2342 = vmatpush2.bf16.msra.mxu0 %v3725_v11  ;;  %v1739_v11 = vsub.s32 2, %v4053_v25 }
 0x2c1   :  { %2343 = vmatprep.subr.bf16.mxu0 %v3730_v12  ;;  %v3769_v12 = vld [vmem:[#allocation13 + $0xd0] sm:$0xff]  }
 0x2c4   :  { %2344 = vmatpush2.bf16.msra.mxu0 %v3728_v13  ;;  %v3770_v13 = vld [vmem:[#allocation13 + $0x90] sm:$0xff]  }
 0x2c5   :  { %2345 = vmatprep.subr.bf16.mxu0 %v3733_v14  ;;  %v1740_v14 = vrot.slane %v4107_v48, %v1739_v11 }
 0x2c8   :  { %2346 = vmatpush2.bf16.msra.mxu0 %v3731_v15  ;;  %v3771_v15 = vld [vmem:[#allocation13 + $0xc8] sm:$0xff]  }
 0x2c9   :  { %2347 = vmatprep.subr.bf16.mxu0 %v3736_v16  ;;  %v3772_v16 = vld [vmem:[#allocation13 + $0x88] sm:$0xff]  }
 0x2cc   :  { %2348 = vmatpush2.bf16.msra.mxu0 %v3734_v17 }
 0x2cd   :  { %2349 = vmatprep.subr.bf16.mxu0 %v3739_v18  ;;  %v3773_v18 = vld [vmem:[#allocation13 + $0xc0] sm:$0xff]  }
 0x2d0   :  { %2350 = vmatpush2.bf16.msra.mxu0 %v3737_v19  ;;  %v3774_v19 = vld [vmem:[#allocation13 + $0x80] sm:$0xff]  }
 0x2d1   :  { %2351 = vmatprep.subr.bf16.mxu0 %v3742_v20 }
 0x2d4   :  { %2352 = vmatpush2.bf16.msra.mxu0 %v3740_v21 }
 0x2d5   :  { %3276 = vmatprep.subr.bf16.mxu0 %v3775_v30 }
 0x2d7   :  { %2354 = vmatmul.mubr.bf16.vlgmr.msra.gmra.mxu0 %v4102_v46  ;;  %v3789_v46 = vld [vmem:[#allocation13 + $0x140] sm:$0xff]  }
 0x2d8   :  { %3277 = vmatpush3.bf16.msra.mxu0 %v3776_v32 }
 0x2d9   :  { %3278 = vmatprep.subr.bf16.mxu0 %v3777_v33 }
 0x2dc   :  { %3279 = vmatpush3.bf16.msra.mxu0 %v3778_v34 }
 0x2dd   :  { %3280 = vmatprep.subr.bf16.mxu0 %v3779_v35 }
 0x2e0   :  { %3281 = vmatpush3.bf16.msra.mxu0 %v3780_v37 }
 0x2e1   :  { %3282 = vmatprep.subr.bf16.mxu0 %v3781_v38 }
 0x2e4   :  { %3283 = vmatpush3.bf16.msra.mxu0 %v3782_v39 }
 0x2e5   :  { %3284 = vmatprep.subr.bf16.mxu0 %v3783_v40 }
 0x2e8   :  { %3285 = vmatpush3.bf16.msra.mxu0 %v3784_v41 }
 0x2e9   :  { %3286 = vmatprep.subr.bf16.mxu0 %v3785_v42 }
 0x2ec   :  { %3287 = vmatpush3.bf16.msra.mxu0 %v3786_v43 }
 0x2ed   :  { %3288 = vmatprep.subr.bf16.mxu0 %v3787_v44 }
 0x2f0   :  { %3289 = vmatpush3.bf16.msra.mxu0 %v3788_v45 }
 0x2f1   :  { %3290 = vmatprep.subr.bf16.mxu0 %v3789_v46 }
 0x2f4   :  { %3291 = vmatpush3.bf16.msra.mxu0 %v3790_v47 }
 0x357   :  { %v2273_v36 = vpop.f32.mrf.mxu0  ;;  %v2314_v50 = vpop.f32.mrf.mxu1 }
 0x358   :  { %v2274_v51 = vadd.f32 %v2273_v36, %v1732_v5  ;;  %v2315_v17 = vadd.f32 %v2314_v50, %v1740_v14 }
 0x359   :  { %v2275_v52 = vpop.f32.mrf.mxu0  ;;  %v2316_v53 = vpop.f32.mrf.mxu1 }
 0x35a   :  { %v2276_v54 = vadd.f32 %v2275_v52, %v1736_v8  ;;  %v2317_v55 = vadd.f32 %v2316_v53, %v1744_v31  ;;  %v2362_v56 = vmax.f32 %v2274_v51, 0.0  ;;  %v2364_v20 = vmax.f32 %v2315_v17, 0.0 }
 0x35b   :  { %v2277_v57 = vpop.f32.mrf.mxu0  ;;  %v2318_v58 = vpop.f32.mrf.mxu1 }
 0x35c   :  { %v2363_v59 = vmax.f32 %v2276_v54, 0.0  ;;  %v2365_v60 = vmax.f32 %v2317_v55, 0.0  ;;  %v2368_v0 = vpack.c.bf16 %v2362_v56, %v2362_v56  ;;  %v2370_v21 = vpack.c.bf16 %v2364_v20, %v2364_v20 }
 0x35d   :  { %v2278_v61 = vpop.f32.mrf.mxu0  ;;  %v2319_v62 = vpop.f32.mrf.mxu1 }
 0x35e   :  { %v2369_v26 = vpack.c.bf16 %v2363_v59, %v2363_v59  ;;  %v2371_v1 = vpack.c.bf16 %v2365_v60, %v2365_v60 }
 0x360   :  { %2797 = vmatprep.mubr.bf16.mxu1 %v2369_v26 }
 0x361   :  { %2798 = vmatmul.mubr.bf16.vlgmr.msra.gmra.mxu1 %v2368_v0 }
 0x362   :  { %3255 = vmatpush3.bf16.msra.mxu1 %v3760_v63  ;;  %2837 = vmatprep.mubr.bf16.mxu1 %v2371_v1 }
 0x363   :  { %3256 = vmatprep.subr.bf16.mxu1 %v3761_v28 }
 0x366   :  { %3257 = vmatpush3.bf16.msra.mxu1 %v3762_v2 }
 0x367   :  { %3258 = vmatprep.subr.bf16.mxu1 %v3763_v3 }
 0x36a   :  { %3259 = vmatpush3.bf16.msra.mxu1 %v3764_v4 }
 0x36b   :  { %3260 = vmatprep.subr.bf16.mxu1 %v3765_v6 }
 0x36e   :  { %3261 = vmatpush3.bf16.msra.mxu1 %v3766_v7 }
 0x36f   :  { %3262 = vmatprep.subr.bf16.mxu1 %v3767_v9 }
 0x372   :  { %3263 = vmatpush3.bf16.msra.mxu1 %v3768_v10 }
 0x373   :  { %3264 = vmatprep.subr.bf16.mxu1 %v3769_v12 }
 0x376   :  { %3265 = vmatpush3.bf16.msra.mxu1 %v3770_v13 }
 0x377   :  { %3266 = vmatprep.subr.bf16.mxu1 %v3771_v15 }
 0x37a   :  { %3267 = vmatpush3.bf16.msra.mxu1 %v3772_v16 }
 0x37b   :  { %3268 = vmatprep.subr.bf16.mxu1 %v3773_v18 }
 0x37e   :  { %3269 = vmatpush3.bf16.msra.mxu1 %v3774_v19 }
 0x381   :  { %2838 = vmatmul.mubr.bf16.vlgmr.msra.gmra.mxu1 %v2370_v21 }
 0x397   :  { %v2355_v29 = vpop.f32.mrf.mxu0 }
 0x398   :  { %v2356_v30 = vadd.f32 %v2355_v29, %v1748_v24 }
 0x399   :  { %v2357_v32 = vpop.f32.mrf.mxu0 }
 0x39a   :  { %v2358_v33 = vadd.f32 %v2357_v32, %v1752_v27  ;;  %v2366_v34 = vmax.f32 %v2356_v30, 0.0 }
 0x39b   :  { %v2359_v35 = vpop.f32.mrf.mxu0 }
 0x39c   :  { %v2367_v37 = vmax.f32 %v2358_v33, 0.0  ;;  %v2372_v40 = vpack.c.bf16 %v2366_v34, %v2366_v34 }
 0x39d   :  { %v2360_v38 = vpop.f32.mrf.mxu0 }
 0x39e   :  { %v2373_v39 = vpack.c.bf16 %v2367_v37, %v2367_v37 }
 0x3a0   :  { %2877 = vmatprep.mubr.bf16.mxu0 %v2373_v39 }
 0x3a1   :  { %2878 = vmatmul.mubr.bf16.vlgmr.msra.gmra.mxu0 %v2372_v40 }
 0x421   :  { %v3248_v41 = vpop.f32.mrf.mxu1 }
 0x423   :  { %v3249_v42 = vpop.f32.mrf.mxu1 }
 0x424   :  { %v3250_v48 = vadd.f32 %v3249_v42, %v3248_v41 }
 0x425   :  { %v3251_v43 = vpop.f32.mrf.mxu1 }
 0x426   :  { %v2800_v31 = vadd.f32 %v3250_v48, %v3183_v49 }
 0x427   :  { %v3252_v25 = vpop.f32.mrf.mxu1 }
 0x441   :  { %v3270_v44 = vpop.f32.mrf.mxu1 }
 0x443   :  { %v3271_v45 = vpop.f32.mrf.mxu1 }
 0x444   :  { %v3272_v5 = vadd.f32 %v3271_v45, %v3270_v44 }
 0x445   :  { %v3273_v46 = vpop.f32.mrf.mxu1 }
 0x446   :  { %v2840_v50 = vadd.f32 %v3272_v5, %v2800_v31 }
 0x447   :  { %v3274_v47 = vpop.f32.mrf.mxu1 }
 0x461   :  { %v3292_v8 = vpop.f32.mrf.mxu0 }
 0x463   :  { %v3293_v36 = vpop.f32.mrf.mxu0 }
 0x464   :  { %v3294_v51 = vadd.f32 %v3293_v36, %v3292_v8 }
 0x465   :  { %v3295_v52 = vpop.f32.mrf.mxu0 }
 0x466   :  { %v2880_v53 = vadd.f32 %v3294_v51, %v2840_v50 }
 0x467   :  { %v3296_v54 = vpop.f32.mrf.mxu0 }
 0x468   :  { %2885 = vst [vmem:[%s4140_s13] sm:$0xff] %v2880_v53 }
 0x469   :  { %2890 = vsyncpa [#allocation4], 1 }
 0x46a   :  { %2891 = vsyncpa [#allocation6], 1 }
 0x46b   :  { %2892 = vsyncpa [#allocation9], 1 }
 0x46c   :  { %2893 = vsyncpa [#allocation12], 1 }

</bundles_post_ra>
